<compile_context>
chip_gen: v6e
topology: v6e:2x2x1
jax: 0.10.0
libtpu: 0.0.40
codegen_flags: <defaults>
</compile_context>

<pallas_src>
import functools

import numpy as np
import jax
import jax.numpy as jnp
from jax.experimental import pallas as pl
from jax.experimental.pallas import tpu as pltpu


_LANE = 128
_SUBLANE = 8


def _round_up(x, m):
    return ((x + m - 1) // m) * m


# ---------------------------------------------------------------------------
# Kernel: fused (freqs-Linear || scale-Linear) + Gabor nonlinearity
# ---------------------------------------------------------------------------
def _real_gabor_kernel(scalars_ref, x_ref, w_ref, b_ref, out_ref, *,
                       out_pad, use_mxu):
    omega0 = scalars_ref[0]          # SMEM scalar
    scale0 = scalars_ref[1]          # SMEM scalar

    x = x_ref[...]                   # (TILE_N, K)
    w = w_ref[...]                   # (K, 2*out_pad)  packed [w_freqs | w_scale]

    if use_mxu:
        lin = jnp.dot(x, w, preferred_element_type=jnp.float32)
    else:
        # K is tiny (e.g. 2-D/3-D coordinates): a K-deep matmul wastes the
        # systolic array; broadcast multiply-adds on the VPU instead.
        lin = x[:, 0:1] * w[0:1, :]
        for k in range(1, x.shape[1]):
            lin = lin + x[:, k:k + 1] * w[k:k + 1, :]

    lin = lin + b_ref[...]           # (TILE_N, 2*out_pad)

    # Split at the lane-aligned boundary: first half -> freqs, second -> scale.
    omega = omega0 * lin[:, :out_pad]
    s = scale0 * lin[:, out_pad:]
    out_ref[...] = jnp.cos(omega) * jnp.exp(-(s * s))


# ---------------------------------------------------------------------------
# Wrapper
# ---------------------------------------------------------------------------
def real_gabor_forward(x, w_freqs, b_freqs, w_scale, b_scale,
                       omega0, scale0, *, tile_n=256):
    """x: (N, in_features); weights stored transposed vs torch: (in, out)."""
    n, in_features = x.shape
    out_features = w_freqs.shape[1]
    f32 = jnp.float32

    out_pad = _round_up(out_features, _LANE)
    tile_n = min(tile_n, _round_up(n, _SUBLANE))
    n_pad = _round_up(n, tile_n)

    # Zero-pad batch to a tile multiple and output dim to lane width; padded
    # rows/lanes are sliced off below (padded weight columns are exactly zero).
    x_p = jnp.zeros((n_pad, in_features), f32).at[:n, :].set(x.astype(f32))

    def pad_out(a):
        a = a.reshape(-1, out_features).astype(f32)
        return jnp.zeros((a.shape[0], out_pad), f32).at[:, :out_features].set(a)

    w_packed = jnp.concatenate([pad_out(w_freqs), pad_out(w_scale)], axis=1)
    b_packed = jnp.concatenate([pad_out(b_freqs), pad_out(b_scale)], axis=1)
    scalars = jnp.array([omega0, scale0], f32)

    use_mxu = in_features > 8
    grid = (n_pad // tile_n,)

    out_p = pl.pallas_call(
        functools.partial(_real_gabor_kernel, out_pad=out_pad, use_mxu=use_mxu),
        out_shape=jax.ShapeDtypeStruct((n_pad, out_pad), f32),
        grid=grid,
        in_specs=[
            # omega0 / scale0 as SMEM scalars (no recompile on hyperparam sweep)
            pl.BlockSpec(memory_space=pltpu.MemorySpace.SMEM),
            # batch-tiled activations
            pl.BlockSpec((tile_n, in_features), lambda i: (i, 0)),
            # packed weights / bias: VMEM-resident across all grid steps
            pl.BlockSpec((in_features, 2 * out_pad), lambda i: (0, 0)),
            pl.BlockSpec((1, 2 * out_pad), lambda i: (0, 0)),
        ],
        out_specs=pl.BlockSpec((tile_n, out_pad), lambda i: (i, 0)),
        compiler_params=pltpu.CompilerParams(
            dimension_semantics=("parallel",)),
    )(scalars, x_p, w_packed, b_packed)

    return out_p[:n, :out_features]


# Pure-JAX reference (mirrors the PyTorch forward) for validation.
def real_gabor_reference(x, w_freqs, b_freqs, w_scale, b_scale, omega0, scale0):
    omega = omega0 * (x @ w_freqs + b_freqs)
    s = (x @ w_scale + b_scale) * scale0
    return jnp.cos(omega) * jnp.exp(-(s ** 2))


if __name__ == "__main__":
    in_features = 2       # coordinate-style input
    out_features = 32
    batch = 300           # deliberately not a multiple of the tile size
    omega0 = 10.0         # module defaults
    sigma0 = 10.0

    key = jax.random.PRNGKey(0)
    kx, kwf, kbf, kws, kbs = jax.random.split(key, 5)
    bound = 1.0 / np.sqrt(in_features)   # nn.Linear default init bound

    x = jax.random.uniform(kx, (batch, in_features), jnp.float32, -1.0, 1.0)
    w_freqs = jax.random.uniform(kwf, (in_features, out_features), jnp.float32,
                                 -bound, bound)
    b_freqs = jax.random.uniform(kbf, (out_features,), jnp.float32, -bound, bound)
    w_scale = jax.random.uniform(kws, (in_features, out_features), jnp.float32,
                                 -bound, bound)
    b_scale = jax.random.uniform(kbs, (out_features,), jnp.float32, -bound, bound)

    out = real_gabor_forward(x, w_freqs, b_freqs, w_scale, b_scale,
                             omega0, sigma0, tile_n=128)
    out = jax.block_until_ready(out)

    ref = real_gabor_reference(x, w_freqs, b_freqs, w_scale, b_scale,
                               omega0, sigma0)
    np.testing.assert_allclose(np.asarray(out), np.asarray(ref),
                               rtol=1e-4, atol=1e-4)
    print("KERNEL_OK")
</pallas_src>

<mosaic_0001>
module attributes {stable_mosaic.version = 11 : i64} {
  func.func @_real_gabor_kernel(%arg0: i32, %arg1: memref<2xf32, #tpu.memory_space<smem>>, %arg2: memref<128x2xf32, #tpu.memory_space<vmem>>, %arg3: memref<2x256xf32, #tpu.memory_space<vmem>>, %arg4: memref<1x256xf32, #tpu.memory_space<vmem>>, %arg5: memref<128x128xf32, #tpu.memory_space<vmem>>) attributes {dimension_semantics = [#tpu.dimension_semantics<parallel>], iteration_bounds = array<i64: 3>, scalar_prefetch = 0 : i64, scratch_operands = 0 : i64, tpu.core_type = #tpu.core_type<tc>, window_params = [{transform_indices = @transform_0, window_bounds = array<i64: 2>}, {transform_indices = @transform_1, window_bounds = array<i64: 128, 2>}, {pipeline_mode = #tpu.pipeline_mode<synchronous>, transform_indices = @transform_2, window_bounds = array<i64: 2, 256>}, {pipeline_mode = #tpu.pipeline_mode<synchronous>, transform_indices = @transform_3, window_bounds = array<i64: 1, 256>}, {transform_indices = @transform_4, window_bounds = array<i64: 128, 128>}]} {
    %c0 = arith.constant 0 : index
    %0 = memref.load %arg1[%c0] : memref<2xf32, #tpu.memory_space<smem>>
    %c1 = arith.constant 1 : index
    %1 = memref.load %arg1[%c1] : memref<2xf32, #tpu.memory_space<smem>>
    %c0_0 = arith.constant 0 : index
    %c0_1 = arith.constant 0 : index
    %2 = vector.load %arg2[%c0_0, %c0_1] : memref<128x2xf32, #tpu.memory_space<vmem>>, vector<128x2xf32>
    %c0_2 = arith.constant 0 : index
    %c0_3 = arith.constant 0 : index
    %3 = vector.load %arg3[%c0_2, %c0_3] : memref<2x256xf32, #tpu.memory_space<vmem>>, vector<2x256xf32>
    %4 = vector.extract_strided_slice %2 {offsets = [0, 0], sizes = [128, 1], strides = [1, 1]} : vector<128x2xf32> to vector<128x1xf32>
    %5 = vector.extract_strided_slice %3 {offsets = [0, 0], sizes = [1, 256], strides = [1, 1]} : vector<2x256xf32> to vector<1x256xf32>
    %6 = vector.broadcast %4 : vector<128x1xf32> to vector<128x256xf32>
    %7 = vector.broadcast %5 : vector<1x256xf32> to vector<128x256xf32>
    %8 = arith.mulf %6, %7 : vector<128x256xf32>
    %9 = vector.extract_strided_slice %2 {offsets = [0, 1], sizes = [128, 1], strides = [1, 1]} : vector<128x2xf32> to vector<128x1xf32>
    %10 = vector.extract_strided_slice %3 {offsets = [1, 0], sizes = [1, 256], strides = [1, 1]} : vector<2x256xf32> to vector<1x256xf32>
    %11 = vector.broadcast %9 : vector<128x1xf32> to vector<128x256xf32>
    %12 = vector.broadcast %10 : vector<1x256xf32> to vector<128x256xf32>
    %13 = arith.mulf %11, %12 : vector<128x256xf32>
    %14 = arith.addf %8, %13 : vector<128x256xf32>
    %c0_4 = arith.constant 0 : index
    %c0_5 = arith.constant 0 : index
    %15 = vector.load %arg4[%c0_4, %c0_5] : memref<1x256xf32, #tpu.memory_space<vmem>>, vector<1x256xf32>
    %16 = vector.broadcast %15 : vector<1x256xf32> to vector<128x256xf32>
    %17 = arith.addf %14, %16 : vector<128x256xf32>
    %18 = vector.extract_strided_slice %17 {offsets = [0, 0], sizes = [128, 128], strides = [1, 1]} : vector<128x256xf32> to vector<128x128xf32>
    %19 = vector.broadcast %0 : f32 to vector<128x128xf32>
    %20 = arith.mulf %19, %18 : vector<128x128xf32>
    %21 = vector.extract_strided_slice %17 {offsets = [0, 128], sizes = [128, 128], strides = [1, 1]} : vector<128x256xf32> to vector<128x128xf32>
    %22 = vector.broadcast %1 : f32 to vector<128x128xf32>
    %23 = arith.mulf %22, %21 : vector<128x128xf32>
    %24 = math.cos %20 : vector<128x128xf32>
    %25 = arith.mulf %23, %23 : vector<128x128xf32>
    %cst = arith.constant 0.000000e+00 : f32
    %26 = vector.broadcast %cst : f32 to vector<128x128xf32>
    %27 = arith.subf %26, %25 : vector<128x128xf32>
    %28 = math.exp %27 : vector<128x128xf32>
    %29 = arith.mulf %24, %28 : vector<128x128xf32>
    %c0_6 = arith.constant 0 : index
    %c0_7 = arith.constant 0 : index
    %30 = vector.load %arg5[%c0_6, %c0_7] : memref<128x128xf32, #tpu.memory_space<vmem>>, vector<128x128xf32>
    tpu.vector_store %arg5[%c0_6, %c0_7], %29 {strides = array<i32>} : memref<128x128xf32, #tpu.memory_space<vmem>>, vector<128x128xf32>,
    return
  }
  func.func @transform_0(%arg0: i32) -> i32 {
    %c0_i32 = arith.constant 0 : i32
    %c0_i32_0 = arith.constant 0 : i32
    return %c0_i32 : i32
  }
  func.func @transform_1(%arg0: i32) -> (i32, i32) {
    %c0_i32 = arith.constant 0 : i32
    %c0_i32_0 = arith.constant 0 : i32
    return %arg0, %c0_i32 : i32, i32
  }
  func.func @transform_2(%arg0: i32) -> (i32, i32) {
    %c0_i32 = arith.constant 0 : i32
    %c0_i32_0 = arith.constant 0 : i32
    %c0_i32_1 = arith.constant 0 : i32
    return %c0_i32, %c0_i32_0 : i32, i32
  }
  func.func @transform_3(%arg0: i32) -> (i32, i32) {
    %c0_i32 = arith.constant 0 : i32
    %c0_i32_0 = arith.constant 0 : i32
    %c0_i32_1 = arith.constant 0 : i32
    return %c0_i32, %c0_i32_0 : i32, i32
  }
  func.func @transform_4(%arg0: i32) -> (i32, i32) {
    %c0_i32 = arith.constant 0 : i32
    %c0_i32_0 = arith.constant 0 : i32
    return %arg0, %c0_i32 : i32, i32
  }
}

</mosaic_0001>

<bundles_post_ra>
// kernel: tpu_custom_call.1
= control target key start
LH: loop header
LB: loop body
LE: loop exit
PB: predicated region body
PF: predicated region fallthrough
CT: control target
= control target key end

     0   :  { %9 = vsyncpa [#allocation4], 0  ;;  %s4639_s0 = inlined_call_operand.vmem [shape: f32[2], index: 0, kind: input, shape index: {}]   ;;  %s4640_s1 = inlined_call_operand.vmem [shape: f32[384,2], index: 1, kind: input, shape index: {}]   ;;  %s4641_s2 = inlined_call_operand.vmem [shape: f32[2,256], index: 2, kind: input, shape index: {}]   ;;  %s4642_s3 = inlined_call_operand.vmem [shape: f32[1,256], index: 3, kind: input, shape index: {}]   ;;  %s4643_s4 = inlined_call_operand.hbm [shape: f32[384,128], index: 4, kind: output, shape index: {}]  }
   0x1   :  { %10 = vsyncpa [#allocation3], 0 }
   0x2   :  { %12 = vsyncpa [#allocation3 + $0x1], 0  ;;  %s2841_s15 = smov 0   ;;  %s2843_s16 = smov 0  }
   0x3   :  { %s2845_s17 = smov 0   ;;  %s2847_s18 = smov 0  }
   0x4 LB: > { %s2862_s19 = sadd.s32 4294967295, %s2802_s18   ;;  %s2419_s20 = sadd.s32 4294967294, %s2802_s18   ;;  %s2802_s18 = sphi %s2847_s18, %s4735_s18   ;;  %s2798_s17 = sphi %s2845_s17, %s4734_s17   ;;  %s2794_s16 = sphi %s2843_s16, %s4733_s16   ;;  %s2790_s15 = sphi %s2841_s15, %s4732_s15  }
   0x5   : > { %s2866_s21 = sadd.s32 1, %s2802_s18   ;;  %s114_s22 = sadd.s32 1, %s2798_s17 }
   0x6   : > { %s111_s23 = ssub.s32 %s2802_s18, %s2866_s21  ;;  %p124_p0 = scmp.ne.s32.totalorder %s2798_s17, %s2794_s16 }
   0x7   : > { %p112_p1 = scmp.eq.s32.totalorder %s111_s23, 0  ;;  %p125_p2 = scmp.eq.s32.totalorder %s2862_s19, 2 }
   0x8   : > { %p130_p3 = scmp.ne.s32.totalorder %s2794_s16, %s2790_s15  ;;  %p131_p4 = scmp.eq.s32.totalorder %s2419_s20, 2 }
   0x9   : > { %s2877_s24 = scalar_select %p112_p1, %s2798_s17, %s114_s22  }
   0xa   : > { %p2879_p5 = por %p125_p2, %p124_p0  ;;  %p2883_p6 = por %p131_p4, %p130_p3 }
   0xb   : > { %p2420_p7 = scmp.ge.s32.totalorder %s2802_s18, 1  ;;  %p138_p8 = scmp.lt.s32.totalorder %s2802_s18, 4 }
   0xc   : > { %p2577_p9 = scmp.eq.s32.totalorder %s2862_s19, 0  ;;  %s151_s30 = sshll.u32 %s4639_s0, 4  ;;  %s152_s30 = int_to_ptr.vmem [resolvable:$true] %s151_s30 }
   0xd   : > { %p2890_p10 = pnand %p2420_p7, %p138_p8  ;;  %s2723_s5 = scalar_lea.vmem %s152_s30, 16 }
   0xe   : > { %p2724_p13 = scmp.ne.s32.totalorder %s152_s30, %s2723_s5  ;;  %p2731_p3 = scmp.lt.s32.totalorder %s152_s30, %s152_s30 }
   0xf   : > { %p2569_p11 = pneg %p2890_p10  ;;  %p2732_p4 = scmp.lt.s32.totalorder %s2723_s5, %s2723_s5 }
  0x11   : > { %p2570_p12 = pnand %p2577_p9, %p2569_p11  ;;  %p2733_p7 = por %p2732_p4, %p2731_p3 }
  0x13   : > { %p2725_p0 = pneg %p2570_p12 }
  0x15   : > { %p2726_p1 = pnand %p2725_p0, %p2724_p13 }
  0x17   : > { %p2727_p2 = pneg %p2726_p1 }
  0x19   : > { %p2734_p8 = pnand %p2733_p7, %p2727_p2 }
  0x1b   : > { %2737 = shalt.err (!%p2734_p8)
}
  0x1c   : > { %s2804_s6 = smov [#allocation2]   ;;  %179 = sbr.rel (%p2890_p10) target bundleno = 701 (0x2bd), region = 36 }
  0x1d   : > { %2572 = dma.vmem_to_smem (!%p2570_p12), %s152_s30, 16, %s2804_s6, [#allocation4]  }
  0x21   : > { %2781 = dma.done.wait (%p2577_p9), [#allocation4], 16  }
  0x22   : > { %2783 = vsyncadd (%p2577_p9), [#allocation4], 4294967280 }
  0x23   : > { %185 = sfence }
  0x24   : > { %s2426_s7 = sshll.u32 %s2862_s19, 4  ;;  %v313_v0 = vlaneseq  ;;  %v2805_v1 = vmov 0   ;;  %v2911_v3 = vld [vmem:[%s4641_s2] sm:$0xf]  ;;  %v2806_v28 = vmov 1   ;;  %s213_s14 = sld [smem:[#allocation2]] }
  0x25   : > { %2624 = vset.pattern.permute.xlu1 %v2805_v1  ;;  %2623 = vset.pattern.permute.xlu0 %v2805_v1  ;;  %p207_p11 = scmp.lt.s32.totalorder %s2426_s7, 47  ;;  %s2428_s23 = sld [smem:[#allocation2 + $0x1]] }
  0x26   : > { %v314_v2 = vshrl.u32 %v313_v0, 7  ;;  %s203_s27 = sand.u32 1, %s2794_s16   ;;  %s2498_s30 = sshll.u32 %s2862_s19, 11 }
  0x27   : > { %s4737_s7 = smov (!%p207_p11, %s2426_s7), 47  ;;  %s3337_s28 = sshll.u32 %s203_s27, 7 }
  0x28   : > { %v319_v4 = vsub.s32 2, %v314_v2  ;;  %s2427_s10 = sshll.u32 %s4737_s7, 3  ;;  %v2918_v5 = vsub.s32 0, %v314_v2  ;;  %v433_v22 = vsub.s32 3, %v314_v2  ;;  %v2940_v25 = vsub.s32 1, %v314_v2  ;;  %s3365_s29 = scalar_lea.vmem [#allocation5], %s3337_s28 }
  0x29   : > { %s2916_s13 = scalar_lea.vmem %s4640_s1, %s2427_s10  ;;  %s2345_s5 = sshll.u32 %s3365_s29, 4  ;;  %s4594_s5 = int_to_ptr.vmem [resolvable:$true] %s2345_s5 }
  0x2a   : > { %v320_v6 = vrot.slane %v2911_v3, %v319_v4  ;;  %v217_v7 = vld [vmem:[%s2916_s13 + $0x10] sm:$0xff]  ;;  %v215_v8 = vld [vmem:[%s2916_s13] sm:$0xff]  ;;  %v218_v10 = vld [vmem:[%s2916_s13 + $0x18] sm:$0xff]  ;;  %v434_v26 = vrot.slane %v2911_v3, %v433_v22  ;;  %v316_v29 = vrot.slane %v2911_v3, %v2918_v5  ;;  %s4592_s8 = scalar_lea.hbm %s4643_s4, %s2498_s30  ;;  %s4599_s19 = scalar_lea.sflag [#allocation3], %s203_s27 }
  0x2b   : > { %244 = vperm.xlu1 %2624, %v217_v7   ;;  %234 = vperm.xlu0 %2623, %v215_v8   ;;  %v216_v11 = vld [vmem:[%s2916_s13 + $0x8] sm:$0xff]  ;;  %v219_v13 = vld [vmem:[%s2916_s13 + $0x20] sm:$0xff]  ;;  %v222_v14 = vld [vmem:[%s2916_s13 + $0x38] sm:$0xff]  ;;  %s2738_s9 = scalar_lea.vmem %s4594_s5, 2048  ;;  %s2813_s10 = smov [#allocation5]  }
  0x2c   : > { %v2924_v9 = vrot.slane %v320_v6, %v2918_v5  ;;  %v220_v12 = vld [vmem:[%s2916_s13 + $0x28] sm:$0xff]  ;;  %v221_v15 = vld [vmem:[%s2916_s13 + $0x30] sm:$0xff]  ;;  %v223_v17 = vld [vmem:[%s2916_s13 + $0x40] sm:$0xff]  ;;  %v2944_v27 = vrot.slane %v434_v26, %v2940_v25  ;;  %v326_v34 = vrot.slane %v316_v29, %v2918_v5  ;;  %v3039_v26 = vstv %s213_s14  ;;  %p2739_p9 = scmp.ne.s32.totalorder %s4594_s5, %s2738_s9  ;;  %s2742_s11 = sshll.u32 %s2813_s10, 4  ;;  %s2743_s11 = int_to_ptr.vmem [resolvable:$false] %s2742_s11 }
  0x2d   : > { %v224_v16 = vld [vmem:[%s2916_s13 + $0x48] sm:$0xff]  ;;  %v226_v18 = vld [vmem:[%s2916_s13 + $0x58] sm:$0xff]  ;;  %v225_v19 = vld [vmem:[%s2916_s13 + $0x50] sm:$0xff]  ;;  %s2744_s12 = scalar_lea.vmem %s2743_s11, 4096  ;;  %p2745_p13 = scmp.lt.s32.totalorder %s4594_s5, %s2743_s11 }
  0x2e   : > { %v228_v20 = vld [vmem:[%s2916_s13 + $0x68] sm:$0xff]  ;;  %v227_v21 = vld [vmem:[%s2916_s13 + $0x60] sm:$0xff]  ;;  %v230_v23 = vld [vmem:[%s2916_s13 + $0x78] sm:$0xff]  ;;  %p2740_p10 = pnand %p2739_p9, %p2879_p5  ;;  %p2746_p0 = scmp.lt.s32.totalorder %s2744_s12, %s2738_s9 }
  0x2f   : > { %249 = vperm.xlu1 %2624, %v218_v10   ;;  %239 = vperm.xlu0 %2623, %v216_v11   ;;  %v229_v24 = vld [vmem:[%s2916_s13 + $0x70] sm:$0xff] }
  0x30   : > { %p2741_p12 = pneg %p2740_p10  ;;  %p2747_p1 = por %p2746_p0, %p2745_p13 }
  0x32   : > { %p2748_p2 = pnand %p2747_p1, %p2741_p12 }
  0x33   : > { %259 = vperm.xlu1 %2624, %v220_v12   ;;  %254 = vperm.xlu0 %2623, %v219_v13  }
  0x37   : > { %269 = vperm.xlu1 %2624, %v222_v14   ;;  %264 = vperm.xlu0 %2623, %v221_v15  }
  0x3b   : > { %279 = vperm.xlu1 %2624, %v224_v16   ;;  %274 = vperm.xlu0 %2623, %v223_v17  }
  0x3f   : > { %289 = vperm.xlu1 %2624, %v226_v18   ;;  %284 = vperm.xlu0 %2623, %v225_v19  }
  0x43   : > { %299 = vperm.xlu1 %2624, %v228_v20   ;;  %294 = vperm.xlu0 %2623, %v227_v21  }
  0x47   : > { %309 = vperm.xlu1 %2624, %v230_v23   ;;  %304 = vperm.xlu0 %2623, %v229_v24  }
  0x4b   : > { %2626 = vset.pattern.permute.xlu1 %v2806_v28  ;;  %2625 = vset.pattern.permute.xlu0 %v2806_v28 }
  0x4c   : > { %368 = vperm.xlu1 %2626, %v216_v11   ;;  %364 = vperm.xlu0 %2625, %v215_v8   ;;  %v430_v8 = vrot.slane %v2911_v3, %v2940_v25  ;;  %v509_v3 = vld [vmem:[%s4642_s3] sm:$0x3] }
  0x50   : > { %372 = vperm.xlu1 %2626, %v217_v7   ;;  %376 = vperm.xlu0 %2625, %v218_v10  }
  0x54   : > { %380 = vperm.xlu1 %2626, %v219_v13   ;;  %384 = vperm.xlu0 %2625, %v220_v12  }
  0x58   : > { %388 = vperm.xlu1 %2626, %v221_v15   ;;  %392 = vperm.xlu0 %2625, %v222_v14  }
  0x5c   : > { %396 = vperm.xlu1 %2626, %v223_v17   ;;  %400 = vperm.xlu0 %2625, %v224_v16   ;;  %v3029_v16 = vrot.slane %v430_v8, %v2940_v25  ;;  %v3035_v17 = vrot.slane %v509_v3, %v2918_v5 }
  0x60   : > { %404 = vperm.xlu1 %2626, %v225_v19   ;;  %408 = vperm.xlu0 %2625, %v226_v18  }
  0x64   : > { %412 = vperm.xlu1 %2626, %v227_v21   ;;  %416 = vperm.xlu0 %2625, %v228_v20  }
  0x68   : > { %420 = vperm.xlu1 %2626, %v229_v24   ;;  %424 = vperm.xlu0 %2625, %v230_v23  }
  0xa6   : > { %v2948_v30 = vpop.permute.xlu1 %244  ;;  %v235_v31 = vpop.permute.xlu0 %234 }
  0xa7   : > { %v2952_v32 = vmul.f32 %v2924_v9, %v2948_v30  ;;  %v2955_v33 = vmul.f32 %v2924_v9, %v235_v31  ;;  %v331_v20 = vmul.f32 %v326_v34, %v235_v31  ;;  %v335_v31 = vmul.f32 %v326_v34, %v2948_v30 }
  0xaa   : > { %v250_v35 = vpop.permute.xlu1 %249  ;;  %v240_v36 = vpop.permute.xlu0 %239 }
  0xab   : > { %v2958_v37 = vmul.f32 %v326_v34, %v250_v35  ;;  %v2961_v38 = vmul.f32 %v2924_v9, %v250_v35  ;;  %v2964_v39 = vmul.f32 %v2924_v9, %v240_v36  ;;  %v333_v21 = vmul.f32 %v326_v34, %v240_v36 }
  0xae   : > { %v260_v40 = vpop.permute.xlu1 %259  ;;  %v255_v41 = vpop.permute.xlu0 %254 }
  0xaf   : > { %v2966_v42 = vmul.f32 %v326_v34, %v260_v40  ;;  %v2969_v43 = vmul.f32 %v2924_v9, %v260_v40  ;;  %v2971_v44 = vmul.f32 %v326_v34, %v255_v41  ;;  %v2974_v45 = vmul.f32 %v2924_v9, %v255_v41 }
  0xb2   : > { %v270_v46 = vpop.permute.xlu1 %269  ;;  %v265_v47 = vpop.permute.xlu0 %264 }
  0xb3   : > { %v2976_v48 = vmul.f32 %v326_v34, %v270_v46  ;;  %v2979_v49 = vmul.f32 %v2924_v9, %v270_v46  ;;  %v2981_v50 = vmul.f32 %v326_v34, %v265_v47  ;;  %v2984_v51 = vmul.f32 %v2924_v9, %v265_v47 }
  0xb6   : > { %v280_v52 = vpop.permute.xlu1 %279  ;;  %v275_v53 = vpop.permute.xlu0 %274 }
  0xb7   : > { %v2986_v54 = vmul.f32 %v326_v34, %v280_v52  ;;  %v2989_v55 = vmul.f32 %v2924_v9, %v280_v52  ;;  %v2991_v56 = vmul.f32 %v326_v34, %v275_v53  ;;  %v2994_v57 = vmul.f32 %v2924_v9, %v275_v53 }
  0xb9   : > { %4662 = vst [vmem:[#allocation8_spill] sm:$0xff] %v2986_v54  ;;  %4663 = vst [vmem:[#allocation9_spill] sm:$0xff] %v2989_v55 }
  0xba   : > { %4664 = vst [vmem:[#allocation10_spill] sm:$0xff] %v2994_v57  ;;  %v290_v58 = vpop.permute.xlu1 %289  ;;  %v285_v59 = vpop.permute.xlu0 %284 }
  0xbb   : > { %v2996_v60 = vmul.f32 %v326_v34, %v290_v58  ;;  %v2999_v61 = vmul.f32 %v2924_v9, %v290_v58  ;;  %v3001_v62 = vmul.f32 %v326_v34, %v285_v59  ;;  %v3004_v63 = vmul.f32 %v2924_v9, %v285_v59 }
  0xbd   : > { %4665 = vst [vmem:[#allocation11_spill] sm:$0xff] %v2996_v60  ;;  %4666 = vst [vmem:[#allocation12_spill] sm:$0xff] %v2999_v61 }
  0xbe   : > { %4667 = vst [vmem:[#allocation13_spill] sm:$0xff] %v3001_v62  ;;  %4668 = vst [vmem:[#allocation14_spill] sm:$0xff] %v3004_v63  ;;  %v300_v0 = vpop.permute.xlu1 %299  ;;  %v295_v1 = vpop.permute.xlu0 %294 }
  0xbf   : > { %v3006_v2 = vmul.f32 %v326_v34, %v300_v0  ;;  %v3009_v4 = vmul.f32 %v2924_v9, %v300_v0  ;;  %v3011_v6 = vmul.f32 %v326_v34, %v295_v1  ;;  %v3014_v7 = vmul.f32 %v2924_v9, %v295_v1 }
  0xc1   : > { %4669 = vst [vmem:[#allocation15_spill] sm:$0xff] %v3006_v2  ;;  %4670 = vst [vmem:[#allocation16_spill] sm:$0xff] %v3009_v4 }
  0xc2   : > { %4671 = vst [vmem:[#allocation17_spill] sm:$0xff] %v3011_v6  ;;  %4672 = vst [vmem:[#allocation18_spill] sm:$0xff] %v3014_v7  ;;  %v310_v10 = vpop.permute.xlu1 %309  ;;  %v305_v11 = vpop.permute.xlu0 %304 }
  0xc3   : > { %v3018_v12 = vmul.f32 %v326_v34, %v310_v10  ;;  %v3021_v13 = vmul.f32 %v2924_v9, %v310_v10  ;;  %v3023_v14 = vmul.f32 %v326_v34, %v305_v11  ;;  %v3026_v15 = vmul.f32 %v2924_v9, %v305_v11 }
  0xc4   : > { %v3065_v10 = vrot.slane %v509_v3, %v2940_v25 }
  0xc5   : > { %4673 = vst [vmem:[#allocation19_spill] sm:$0xff] %v3018_v12  ;;  %4674 = vst [vmem:[#allocation20_spill] sm:$0xff] %v3021_v13 }
  0xc6   : > { %4675 = vst [vmem:[#allocation21_spill] sm:$0xff] %v3023_v14  ;;  %4676 = vst [vmem:[#allocation22_spill] sm:$0xff] %v3026_v15 }
  0xc7   : > { %v369_v18 = vpop.permute.xlu1 %368  ;;  %v365_v19 = vpop.permute.xlu0 %364 }
  0xc8   : > { %v447_v22 = vmul.f32 %v3029_v16, %v369_v18  ;;  %v445_v9 = vmul.f32 %v3029_v16, %v365_v19  ;;  %v448_v59 = vmul.f32 %v2944_v27, %v369_v18 }
  0xca   : > { %v479_v23 = vadd.f32 %v447_v22, %v333_v21  ;;  %v477_v24 = vadd.f32 %v445_v9, %v331_v20  ;;  %v446_v21 = vmul.f32 %v2944_v27, %v365_v19  ;;  %v480_v18 = vadd.f32 %v448_v59, %v2964_v39 }
  0xcb   : > { %v3041_v28 = vpop.permute.xlu1 %372  ;;  %v4652_v59 = vmov 683565275  }
  0xcc   : > { %v523_v29 = vadd.f32 %v3035_v17, %v479_v23  ;;  %v521_v35 = vadd.f32 %v3035_v17, %v477_v24  ;;  %v449_v5 = vmul.f32 %v3029_v16, %v3041_v28 }
  0xce   : > { %v3049_v36 = vmul.f32 %v3039_v26, %v523_v29  ;;  %v3052_v40 = vmul.f32 %v3039_v26, %v521_v35  ;;  %v481_v47 = vadd.f32 %v449_v5, %v335_v31  ;;  %v3072_v29 = vstv %s2428_s23 }
  0xcf   : > { %v3076_v31 = vadd.f32 %v446_v21, %v2955_v33 }
  0xd0   : > { %v4645_v41 = vand.u32 2147483647, %v3049_v36  ;;  %v693_v46 = vand.u32 2139095040, %v3049_v36  ;;  %v4644_v52 = vand.u32 2147483647, %v3052_v40  ;;  %v590_v53 = vand.u32 2139095040, %v3052_v40 }
  0xd1   : > { %v525_v8 = vadd.f32 %v3035_v17, %v481_v47 }
  0xd2   : > { %v694_v58 = vshrl.u32 %v693_v46, 23  ;;  %v697_v30 = vand.u32 8388607, %v4645_v41  ;;  %v591_v34 = vshrl.u32 %v590_v53, 23  ;;  %v594_v0 = vand.u32 8388607, %v4644_v52 }
  0xd3   : > { %v3069_v22 = vmul.f32 %v3039_v26, %v525_v8  ;;  %v3079_v46 = vadd.f32 %v3065_v10, %v480_v18  ;;  %v4646_v8 = vmov 2131351028   ;;  %v4654_v18 = vmov 920167782  }
  0xd4   : > { %v2433_v1 = vadd.s32 4294967169, %v694_v58  ;;  %v2429_v11 = vadd.s32 4294967169, %v591_v34  ;;  %v698_v9 = vor.u32 8388608, %v697_v30  ;;  %v595_v23 = vor.u32 8388608, %v594_v0 }
  0xd5   : > { %v796_v25 = vand.u32 2139095040, %v3069_v22  ;;  %v4656_v52 = vmov 1326507024  }
  0xd6   : > { %v700_v20 = vadd.s32 1, %v2433_v1  ;;  %v597_v24 = vadd.s32 1, %v2429_v11  ;;  %v3081_v39 = vshll.u32 %v698_v9, 8  ;;  %v3085_v53 = vshll.u32 %v595_v23, 8 }
  0xd7   : > { %v3088_v0 = vshrl.u32 %v796_v25, 23  ;;  %v4650_v1 = vmov 2475754826  }
  0xd8   : > { %vm701_vm0 = vcmp.gt.s32.totalorder %v700_v20, 0  ;;  %vm598_vm1 = vcmp.gt.s32.totalorder %v597_v24, 0 }
  0xd9   : > { %v702_v35 = vsel %vm701_vm0, %v700_v20, 0  ;;  %v599_v19 = vsel %vm598_vm1, %v597_v24, 0  ;;  %v4648_v20 = vmov 2102212464  }
  0xda   : > { %v703_v3 = vshrl.u32 %v702_v35, 5  ;;  %v704_v5 = vand.u32 31, %v702_v35  ;;  %v3083_v47 = vshrl.u32 %v599_v19, 5  ;;  %v601_v34 = vand.u32 31, %v599_v19 }
  0xdc   : > { %v705_v58 = vsub.s32 32, %v704_v5  ;;  %v707_v30 = vshll.u32 %v4652_v59, %v704_v5  ;;  %v710_v33 = vshll.u32 %v4650_v1, %v704_v5  ;;  %v713_v11 = vshll.u32 %v4646_v8, %v704_v5 }
  0xdd   : > { %v716_v21 = vshll.u32 %v4648_v20, %v704_v5  ;;  %v719_v9 = vshll.u32 %v4654_v18, %v704_v5  ;;  %vm722_vm2 = vcmp.lt.s32.totalorder %v703_v3, 1  ;;  %vm723_vm3 = vcmp.lt.s32.totalorder %v703_v3, 2 }
  0xde   : > { %v708_v23 = vshrl.u32 %v4650_v1, %v705_v58  ;;  %v711_v24 = vshrl.u32 %v4646_v8, %v705_v58  ;;  %v714_v35 = vshrl.u32 %v4648_v20, %v705_v58  ;;  %v706_v25 = vshrl.u32 %v4652_v59, %v705_v58 }
  0xdf   : > { %v717_v19 = vshrl.u32 %v4654_v18, %v705_v58  ;;  %v720_v41 = vshrl.u32 %v4656_v52, %v705_v58  ;;  %v602_v4 = vsub.s32 32, %v601_v34  ;;  %vm724_vm4 = vcmp.lt.s32.totalorder %v703_v3, 3 }
  0xe0   : > { %v709_v13 = vor.u32 %v708_v23, %v707_v30  ;;  %v712_v15 = vor.u32 %v711_v24, %v710_v33  ;;  %v715_v12 = vor.u32 %v714_v35, %v713_v11  ;;  %vm725_vm5 = vcmp.lt.s32.totalorder %v703_v3, 4 }
  0xe1   : > { %v718_v5 = vor.u32 %v717_v19, %v716_v21  ;;  %v721_v14 = vor.u32 %v720_v41, %v719_v9  ;;  %v4677_v58 = vmov 683565275   ;;  %v4678_v11 = vmov 2475754826  }
  0xe2   : > { %v726_v8 = vsel %vm722_vm2, %v706_v25, %v709_v13  ;;  %v727_v20 = vsel %vm725_vm5, %v715_v12, 2102212464  ;;  %v730_v1 = vsel %vm722_vm2, %v709_v13, %v712_v15  ;;  %v734_v59 = vsel %vm722_vm2, %v712_v15, %v715_v12 }
  0xe3   : > { %v728_v18 = vsel %vm724_vm4, %v712_v15, %v727_v20  ;;  %v731_v7 = vsel %vm725_vm5, %v718_v5, 920167782  ;;  %v735_v2 = vsel %vm725_vm5, %v721_v14, 1326507024  ;;  %v604_v52 = vshll.u32 %v4677_v58, %v601_v34 }
  0xe4   : > { %v732_v30 = vsel %vm724_vm4, %v715_v12, %v731_v7  ;;  %v736_v33 = vsel %vm724_vm4, %v718_v5, %v735_v2  ;;  %v605_v23 = vshrl.u32 %v4678_v11, %v602_v4  ;;  %v607_v41 = vshll.u32 %v4678_v11, %v601_v34 }
  0xe5   : > { %v729_v21 = vsel %vm723_vm3, %v726_v8, %v728_v18  ;;  %v733_v9 = vsel %vm723_vm3, %v730_v1, %v732_v30  ;;  %v737_v24 = vsel %vm723_vm3, %v734_v59, %v736_v33  ;;  %v4679_v13 = vmov 2131351028  }
  0xe6   : > { %v608_v35 = vshrl.u32 %v4679_v13, %v602_v4  ;;  %v3111_v15 = vmul.u32.u64.low %v3081_v39, %v737_v24  ;;  %v3112_v20 = vmul.u32.u64.high %v3081_v39, %v737_v24, %v3111_v15  ;;  %v606_v2 = vor.u32 %v605_v23, %v604_v52 }
  0xe7   : > { %v3115_v14 = vmul.u32.u64.low %v3081_v39, %v733_v9  ;;  %v3116_v7 = vmul.u32.u64.high %v3081_v39, %v733_v9, %v3115_v14  ;;  %v610_v25 = vshll.u32 %v4679_v13, %v601_v34  ;;  %v4680_v8 = vmov 2102212464  }
  0xe8   : > { %v609_v12 = vor.u32 %v608_v35, %v607_v41  ;;  %v611_v18 = vshrl.u32 %v4680_v8, %v602_v4  ;;  %v603_v3 = vshrl.u32 %v4677_v58, %v602_v4  ;;  %v613_v59 = vshll.u32 %v4680_v8, %v601_v34 }
  0xe9   : > { %v4681_v1 = vmov 920167782   ;;  %v4682_v5 = vmov 1326507024   ;;  %v745_v33 = vmul.u32 %v3081_v39, %v729_v21  ;;  %vm619_vm6 = vcmp.lt.s32.totalorder %v3083_v47, 1 }
  0xea   : > { %v614_v19 = vshrl.u32 %v4681_v1, %v602_v4  ;;  %v617_v30 = vshrl.u32 %v4682_v5, %v602_v4  ;;  %v612_v24 = vor.u32 %v611_v18, %v610_v25  ;;  %v616_v9 = vshll.u32 %v4681_v1, %v601_v34 }
  0xeb   : > { %vm747_vm7 = vc.u32 %v3112_v20, %v3115_v14  ;;  %v748_v52 = vadd.s32 1, %v3116_v7  ;;  %vm620_vm8 = vcmp.lt.s32.totalorder %v3083_v47, 2  ;;  %vm621_vm9 = vcmp.lt.s32.totalorder %v3083_v47, 3 }
  0xec   : > { %v615_v23 = vor.u32 %v614_v19, %v613_v59  ;;  %v618_v41 = vor.u32 %v617_v30, %v616_v9  ;;  %vm622_vm10 = vcmp.lt.s32.totalorder %v3083_v47, 4  ;;  %v627_v4 = vsel %vm619_vm6, %v606_v2, %v609_v12 }
  0xed   : > { %v749_v39 = vsel %vm747_vm7, %v748_v52, %v3116_v7  ;;  %v624_v21 = vsel %vm622_vm10, %v612_v24, 2102212464  ;;  %v631_v35 = vsel %vm619_vm6, %v609_v12, %v612_v24  ;;  %v623_v25 = vsel %vm619_vm6, %v603_v3, %v606_v2 }
  0xee   : > { %v628_v34 = vsel %vm622_vm10, %v615_v23, 920167782  ;;  %v750_v15 = vadd.s32 %v749_v39, %v745_v33  ;;  %v632_v61 = vsel %vm622_vm10, %v618_v41, 1326507024  ;;  %v625_v6 = vsel %vm621_vm9, %v609_v12, %v624_v21 }
  0xef   : > { %v629_v18 = vsel %vm621_vm9, %v612_v24, %v628_v34  ;;  %v633_v19 = vsel %vm621_vm9, %v615_v23, %v632_v61  ;;  %v2437_v30 = vadd.s32 4294967169, %v3088_v0  ;;  %v572_v12 = vmul.f32 %v3072_v29, %v3079_v46  ;;  %v377_v24 = vpop.permute.xlu0 %376 }
  0xf0   : > { %v630_v59 = vsel %vm620_vm8, %v627_v4, %v629_v18  ;;  %v751_v9 = vadd.s32 536870912, %v750_v15  ;;  %v634_v60 = vsel %vm620_vm8, %v631_v35, %v633_v19  ;;  %v626_v61 = vsel %vm620_vm8, %v623_v25, %v625_v6 }
  0xf1   : > { %v3141_v7 = vmul.u32.u64.low %v3085_v53, %v630_v59  ;;  %v3142_v52 = vmul.u32.u64.high %v3085_v53, %v630_v59, %v3141_v7  ;;  %v3146_v2 = vmul.u32.u64.low %v3085_v53, %v634_v60  ;;  %v3147_v3 = vmul.u32.u64.high %v3085_v53, %v634_v60, %v3146_v2 }
  0xf2   : > { %v3151_v33 = vshrl.u32 %v751_v9, 30  ;;  %v803_v0 = vadd.s32 1, %v2437_v30  ;;  %v522_v23 = vadd.f32 %v3065_v10, %v3076_v31  ;;  %v4658_v41 = vand.u32 2147483647, %v3069_v22 }
  0xf3   : > { %v645_v60 = vadd.s32 1, %v3142_v52  ;;  %v642_v39 = vmul.u32 %v3085_v53, %v626_v61  ;;  %vm644_vm12 = vc.u32 %v3147_v3, %v3141_v7  ;;  %v451_v6 = vmul.f32 %v3029_v16, %v377_v24 }
  0xf4   : > { %v753_v4 = vshll.u32 %v3151_v33, 30  ;;  %vm804_vm11 = vcmp.gt.s32.totalorder %v803_v0, 0  ;;  %v3164_v21 = vmul.f32 %v572_v12, %v572_v12  ;;  %v450_v34 = vmul.f32 %v2944_v27, %v3041_v28 }
  0xf5   : > { %v805_v46 = vsel %vm804_vm11, %v803_v0, 0  ;;  %v646_v31 = vsel %vm644_vm12, %v645_v60, %v3142_v52  ;;  %v571_v35 = vmul.f32 %v3072_v29, %v522_v23  ;;  %v800_v53 = vand.u32 8388607, %v4658_v41 }
  0xf6   : > { %v754_v47 = vsub.s32 %v750_v15, %v753_v4  ;;  %v647_v25 = vadd.s32 %v646_v31, %v642_v39  ;;  %v807_v18 = vand.u32 31, %v805_v46  ;;  %v483_v9 = vadd.f32 %v451_v6, %v2958_v37 }
  0xf7   : > { %v3175_v52 = vadd.f32 %v450_v34, %v2952_v32  ;;  %v3178_v28 = vmul.f32 %v2944_v27, %v377_v24  ;;  %v746_v12 = vadd.s32 %v3115_v14, %v3112_v20  ;;  %v3184_v0 = vmul.f32 %v571_v35, %v571_v35 }
  0xf8   : > { %v756_v59 = vsub.s32 0, %v754_v47  ;;  %v648_v19 = vadd.s32 536870912, %v647_v25  ;;  %v808_v30 = vsub.s32 32, %v807_v18  ;;  %v801_v23 = vor.u32 8388608, %v800_v53 }
  0xf9   : > { %v806_v6 = vshrl.u32 %v805_v46, 5  ;;  %v810_v24 = vshll.u32 %v4677_v58, %v807_v18  ;;  %v3192_v31 = vadd.f32 %v3035_v17, %v483_v9  ;;  %v813_v14 = vshll.u32 %v4678_v11, %v807_v18 }
  0xfa   : > { %v2434_v15 = vmin.u32 %v756_v59, %v754_v47  ;;  %v3182_v61 = vshrl.u32 %v648_v19, 30  ;;  %v811_v37 = vshrl.u32 %v4678_v11, %v808_v30  ;;  %v814_v60 = vshrl.u32 %v4679_v13, %v808_v30 }
  0xfb   : > { %v817_v39 = vshrl.u32 %v4680_v8, %v808_v30  ;;  %v816_v34 = vshll.u32 %v4679_v13, %v807_v18  ;;  %v820_v35 = vshrl.u32 %v4681_v1, %v808_v30  ;;  %v819_v59 = vshll.u32 %v4680_v8, %v807_v18 }
  0xfc   : > { %v758_v4 = vclz %v2434_v15  ;;  %v650_v32 = vshll.u32 %v3182_v61, 30  ;;  %v823_v19 = vshrl.u32 %v4682_v5, %v808_v30  ;;  %v3201_v15 = vshll.u32 %v801_v23, 8 }
  0xfd   : > { %v812_v46 = vor.u32 %v811_v37, %v810_v24  ;;  %v815_v41 = vor.u32 %v814_v60, %v813_v14  ;;  %v818_v9 = vor.u32 %v817_v39, %v816_v34  ;;  %v821_v63 = vor.u32 %v820_v35, %v819_v59 }
  0xfe   : > { %v2435_v20 = vadd.s32 4294967294, %v758_v4  ;;  %v3197_v53 = vsub.s32 %v647_v25, %v650_v32  ;;  %v822_v55 = vshll.u32 %v4681_v1, %v807_v18  ;;  %vm825_vm14 = vcmp.lt.s32.totalorder %v806_v6, 1 }
  0xff   : > { %vm826_vm15 = vcmp.lt.s32.totalorder %v806_v6, 2  ;;  %v809_v32 = vshrl.u32 %v4677_v58, %v808_v30  ;;  %vm828_vm0 = vcmp.lt.s32.totalorder %v806_v6, 4  ;;  %v833_v39 = vsel %vm825_vm14, %v812_v46, %v815_v41 }
 0x100   : > { %vm2436_vm13 = vcmp.lt.s32.totalorder %v2435_v20, 0  ;;  %v653_v4 = vsub.s32 0, %v3197_v53  ;;  %v824_v23 = vor.u32 %v823_v19, %v822_v55  ;;  %vm827_vm1 = vcmp.lt.s32.totalorder %v806_v6, 3 }
 0x101   : > { %v761_v2 = vsel %vm2436_vm13, 0, %v2435_v20  ;;  %v830_v20 = vsel %vm828_vm0, %v818_v9, 2102212464  ;;  %v834_v18 = vsel %vm828_vm0, %v821_v63, 920167782  ;;  %v837_v59 = vsel %vm825_vm14, %v815_v41, %v818_v9 }
 0x102   : > { %v762_v62 = vsub.s32 32, %v761_v2  ;;  %v766_v57 = vsub.s32 4294967266, %v761_v2  ;;  %v2430_v25 = vmin.u32 %v653_v4, %v3197_v53  ;;  %v763_v54 = vshll.u32 %v754_v47, %v761_v2 }
 0x103   : > { %v835_v35 = vsel %vm827_vm1, %v818_v9, %v834_v18  ;;  %vm692_vm2 = vcmp.lt.s32.totalorder %v3049_v36, 0  ;;  %v838_v47 = vsel %vm828_vm0, %v824_v23, 1326507024  ;;  %v4683_v30 = vand.u32 2147483647, %v3049_v36 }
 0x104   : > { %v764_v37 = vshrl.u32 %v746_v12, %v762_v62  ;;  %v767_v60 = vadd.s32 127, %v766_v57  ;;  %v655_v24 = vclz %v2430_v25  ;;  %v829_v62 = vsel %vm825_vm14, %v809_v32, %v812_v46 }
 0x105   : > { %v836_v57 = vsel %vm826_vm15, %v833_v39, %v835_v35  ;;  %vm3218_vm3 = vcmp.le.f32.partialorder %v4683_v30, 0.7853982  ;;  %v831_v19 = vsel %vm827_vm1, %v815_v41, %v830_v20  ;;  %v839_v9 = vsel %vm827_vm1, %v821_v63, %v838_v47  ;;  %v381_v35 = vpop.permute.xlu1 %380 }
 0x106   : > { %v765_v14 = vor.u32 %v764_v37, %v763_v54  ;;  %v768_v34 = vshll.u32 %v767_v60, 23  ;;  %v2431_v55 = vadd.s32 4294967294, %v655_v24  ;;  %v840_v4 = vsel %vm826_vm15, %v837_v59, %v839_v9 }
 0x107   : > { %v3226_v46 = vmul.u32.u64.low %v3201_v15, %v836_v57  ;;  %v3227_v25 = vmul.u32.u64.high %v3201_v15, %v836_v57, %v3226_v46  ;;  %v3231_v37 = vmul.u32.u64.low %v3201_v15, %v840_v4  ;;  %v3232_v60 = vmul.u32.u64.high %v3201_v15, %v840_v4, %v3231_v37 }
 0x108   : > { %v769_v54 = vor.u32 4788187, %v768_v34  ;;  %v772_v12 = vcvt.s32.f32 %v765_v14  ;;  %vm2432_vm4 = vcmp.lt.s32.totalorder %v2431_v55, 0  ;;  %v643_v39 = vadd.s32 %v3141_v7, %v3147_v3 }
 0x109   : > { %v658_v23 = vsel %vm2432_vm4, 0, %v2431_v55  ;;  %v832_v63 = vsel %vm826_vm15, %v829_v62, %v831_v19  ;;  %v776_v18 = vsub.s32 4, %v3151_v33  ;;  %vm589_vm5 = vcmp.lt.s32.totalorder %v3052_v40, 0 }
 0x10a   : > { %v770_v32 = vand.u32 2147483647, %v769_v54  ;;  %v659_v41 = vsub.s32 32, %v658_v23  ;;  %v663_v24 = vsub.s32 4294967266, %v658_v23  ;;  %v526_v14 = vadd.f32 %v3065_v10, %v3175_v52 }
 0x10b   : > { %v3243_v34 = vmul.f32 %v3039_v26, %v3192_v31  ;;  %v660_v59 = vshll.u32 %v3197_v53, %v658_v23  ;;  %v851_v6 = vadd.s32 1, %v3227_v25  ;;  %v2251_v62 = vsub.f32 0.0, %v3184_v0 }
 0x10c   : > { %v773_v20 = vmul.f32 %v772_v12, %v770_v32  ;;  %v661_v7 = vshrl.u32 %v643_v39, %v659_v41  ;;  %v664_v3 = vadd.s32 127, %v663_v24  ;;  %v848_v57 = vmul.u32 %v3201_v15, %v832_v63 }
 0x10d   : > { %vm850_vm6 = vc.u32 %v3232_v60, %v3226_v46  ;;  %v453_v30 = vmul.f32 %v3029_v16, %v381_v35  ;;  %v777_v54 = vsel %vm692_vm2, %v776_v18, %v3151_v33  ;;  %v899_v0 = vand.u32 2139095040, %v3243_v34 }
 0x10e   : > { %v774_v55 = vxor.u32 2147483648, %v773_v20  ;;  %v662_v52 = vor.u32 %v661_v7, %v660_v59  ;;  %v665_v47 = vshll.u32 %v664_v3, 23  ;;  %v852_v31 = vsel %vm850_vm6, %v851_v6, %v3227_v25 }
 0x10f   : > { %v853_v12 = vadd.s32 %v852_v31, %v848_v57  ;;  %v673_v9 = vsub.s32 4, %v3182_v61  ;;  %v896_v4 = vand.u32 2147483647, %v3243_v34  ;;  %v4686_v25 = vsub.f32 0.0, %v3164_v21 }
 0x110   : > { %v775_v53 = vsel %vm692_vm2, %v774_v55, %v773_v20  ;;  %v666_v19 = vor.u32 4788187, %v665_v47  ;;  %v900_v37 = vshrl.u32 %v899_v0, 23  ;;  %v669_v39 = vcvt.s32.f32 %v662_v52 }
 0x111   : > { %v778_v15 = vsel %vm3218_vm3, %v3049_v36, %v775_v53  ;;  %v2269_v32 = vmul.f32 1.442695, %v4686_v25  ;;  %v854_v23 = vadd.s32 536870912, %v853_v12  ;;  %v2267_v41 = vmul.f32 1.442695, %v2251_v62 }
 0x112   : > { %2627 = vcosq.f32 %v778_v15  ;;  %v667_v33 = vand.u32 2147483647, %v666_v19  ;;  %v779_v24 = vsel %vm3218_vm3, 0, %v777_v54  ;;  %v573_v63 = vmul.f32 %v3072_v29, %v526_v14 }
 0x113   : > { %2629 = vsinq.f32 %v778_v15  ;;  %v3269_v20 = vshrl.u32 %v854_v23, 30  ;;  %v2441_v18 = vadd.s32 4294967169, %v900_v37  ;;  %v674_v21 = vsel %vm589_vm5, %v673_v9, %v3182_v61 }
 0x114   : > { %v670_v59 = vmul.f32 %v669_v39, %v667_v33  ;;  %v903_v7 = vand.u32 8388607, %v896_v4  ;;  %v485_v3 = vadd.f32 %v453_v30, %v2971_v44  ;;  %2631 = vpow2.f32 %v2269_v32 }
 0x115   : > { %v856_v6 = vshll.u32 %v3269_v20, 30  ;;  %v484_v2 = vadd.f32 %v3178_v28, %v2961_v38  ;;  %v906_v14 = vadd.s32 1, %v2441_v18  ;;  %v3280_v55 = vand.u32 3, %v779_v24 }
 0x116   : > { %v4687_v62 = vand.u32 2147483647, %v3052_v40  ;;  %v671_v61 = vxor.u32 2147483648, %v670_v59  ;;  %2633 = vpow2.f32 %v2267_v41  ;;  %v3292_v47 = vmul.f32 %v573_v63, %v573_v63 }
 0x117   : > { %v3290_v52 = vsub.s32 %v853_v12, %v856_v6  ;;  %vm907_vm8 = vcmp.gt.s32.totalorder %v906_v14, 0  ;;  %v904_v28 = vor.u32 8388608, %v903_v7  ;;  %v529_v30 = vadd.f32 %v3035_v17, %v485_v3 }
 0x118   : > { %vm3284_vm7 = vcmp.le.f32.partialorder %v4687_v62, 0.7853982  ;;  %v672_v38 = vsel %vm589_vm5, %v671_v61, %v670_v59  ;;  %v908_v31 = vsel %vm907_vm8, %v906_v14, 0  ;;  %v3302_v0 = vadd.f32 %v3065_v10, %v484_v2 }
 0x119   : > { %v676_v44 = vsel %vm3284_vm7, 0, %v674_v21  ;;  %v675_v53 = vsel %vm3284_vm7, %v3052_v40, %v672_v38  ;;  %v859_v54 = vsub.s32 0, %v3290_v52  ;;  %v3305_v12 = vmul.f32 %v2944_v27, %v381_v35 }
 0x11a   : > { %vm784_vm9 = vcmp.lt.s32.totalorder %v3280_v55, 2  ;;  %vm785_vm10 = vcmp.eq.s32.totalorder %v3280_v55, 0  ;;  %vm788_vm11 = vcmp.eq.s32.totalorder %v3280_v55, 2  ;;  %2635 = vcosq.f32 %v675_v53 }
 0x11b   : > { %v910_v15 = vand.u32 31, %v908_v31  ;;  %vm782_vm12 = vweird.f32 %v3049_v36  ;;  %2637 = vsinq.f32 %v675_v53  ;;  %v3311_v19 = vand.u32 3, %v676_v44 }
 0x11c   : > { %v849_v9 = vadd.s32 %v3226_v46, %v3232_v60  ;;  %v2438_v35 = vmin.u32 %v859_v54, %v3290_v52  ;;  %v3316_v25 = vshrl.u32 %v908_v31, 5  ;;  %v3318_v23 = vshll.u32 %v904_v28, 8 }
 0x11d   : > { %v911_v32 = vsub.s32 32, %v910_v15  ;;  %v3321_v37 = vmul.f32 %v3039_v26, %v529_v30  ;;  %v913_v39 = vshll.u32 %v4677_v58, %v910_v15  ;;  %v916_v41 = vshll.u32 %v4678_v11, %v910_v15 }
 0x11e   : > { %v861_v33 = vclz %v2438_v35  ;;  %v919_v24 = vshll.u32 %v4679_v13, %v910_v15  ;;  %v922_v59 = vshll.u32 %v4680_v8, %v910_v15  ;;  %v925_v61 = vshll.u32 %v4681_v1, %v910_v15 }
 0x11f   : > { %v2628_v63 = vpop.eup %2627  ;;  %v914_v46 = vshrl.u32 %v4678_v11, %v911_v32  ;;  %v917_v60 = vshrl.u32 %v4679_v13, %v911_v32  ;;  %v920_v18 = vshrl.u32 %v4680_v8, %v911_v32  ;;  %v923_v6 = vshrl.u32 %v4681_v1, %v911_v32 }
 0x120   : > { %v2630_v21 = vpop.eup %2629  ;;  %v789_v7 = vxor.u32 2147483648, %v2628_v63  ;;  %v2439_v3 = vadd.s32 4294967294, %v861_v33  ;;  %v926_v2 = vshrl.u32 %v4682_v5, %v911_v32  ;;  %v912_v62 = vshrl.u32 %v4677_v58, %v911_v32 }
 0x121   : > { %v786_v14 = vxor.u32 2147483648, %v2630_v21  ;;  %v915_v57 = vor.u32 %v914_v46, %v913_v39  ;;  %vm685_vm13 = vcmp.eq.s32.totalorder %v3311_v19, 2  ;;  %v918_v38 = vor.u32 %v917_v60, %v916_v41  ;;  %v2632_v31 = vpop.eup %2631 }
 0x122   : > { %v790_v44 = vsel %vm788_vm11, %v789_v7, %v2630_v21  ;;  %vm2440_vm14 = vcmp.lt.s32.totalorder %v2439_v3, 0  ;;  %v921_v28 = vor.u32 %v920_v18, %v919_v24  ;;  %vm682_vm15 = vcmp.eq.s32.totalorder %v3311_v19, 0 }
 0x123   : > { %v787_v30 = vsel %vm785_vm10, %v2628_v63, %v786_v14  ;;  %v864_v53 = vsel %vm2440_vm14, 0, %v2439_v3  ;;  %v924_v54 = vor.u32 %v923_v6, %v922_v59  ;;  %v927_v15 = vor.u32 %v926_v2, %v925_v61  ;;  %v2634_v35 = vpop.eup %2633 }
 0x124   : > { %v791_v32 = vsel %vm784_vm9, %v787_v30, %v790_v44  ;;  %vm681_vm0 = vcmp.lt.s32.totalorder %v3311_v19, 2  ;;  %v865_v33 = vsub.s32 32, %v864_v53  ;;  %v869_v39 = vsub.s32 4294967266, %v864_v53 }
 0x125   : > { %vm928_vm1 = vcmp.lt.s32.totalorder %v3316_v25, 1  ;;  %v792_v41 = vsel %vm782_vm12, nan, %v791_v32  ;;  %vm679_vm2 = vweird.f32 %v3052_v40  ;;  %v866_v24 = vshll.u32 %v3290_v52, %v864_v53 }
 0x126   : > { %vm929_vm3 = vcmp.lt.s32.totalorder %v3316_v25, 2  ;;  %vm931_vm4 = vcmp.lt.s32.totalorder %v3316_v25, 4  ;;  %v2300_v55 = vmul.f32 %v2632_v31, %v792_v41  ;;  %v867_v63 = vshrl.u32 %v849_v9, %v865_v33 }
 0x127   : > { %v870_v46 = vadd.s32 127, %v869_v39  ;;  %v933_v60 = vsel %vm931_vm4, %v921_v28, 2102212464  ;;  %vm930_vm5 = vcmp.lt.s32.totalorder %v3316_v25, 3  ;;  %v932_v36 = vsel %vm928_vm1, %v912_v62, %v915_v57  ;;  %v2636_v59 = vpop.eup %2635  ;;  %v3395_v39 = vpop.permute.xlu0 %384 }
 0x128   : > { %v936_v18 = vsel %vm928_vm1, %v915_v57, %v918_v38  ;;  %v937_v52 = vsel %vm931_vm4, %v924_v54, 920167782  ;;  %2316 = vst [vmem:[%s3365_s29 + $0x8] sm:$0xff] %v2300_v55  ;;  %vm795_vm6 = vcmp.lt.s32.totalorder %v3069_v22, 0  ;;  %v868_v9 = vor.u32 %v867_v63, %v866_v24  ;;  %v2638_v6 = vpop.eup %2637 }
 0x129   : > { %v871_v21 = vshll.u32 %v870_v46, 23  ;;  %v938_v7 = vsel %vm930_vm5, %v921_v28, %v937_v52  ;;  %v940_v3 = vsel %vm928_vm1, %v918_v38, %v921_v28  ;;  %v686_v2 = vxor.u32 2147483648, %v2636_v59 }
 0x12a   : > { %v934_v14 = vsel %vm930_vm5, %v918_v38, %v933_v60  ;;  %v939_v62 = vsel %vm929_vm3, %v936_v18, %v938_v7  ;;  %v941_v57 = vsel %vm931_vm4, %v927_v15, 1326507024  ;;  %v683_v61 = vxor.u32 2147483648, %v2638_v6 }
 0x12b   : > { %v4690_v44 = vand.u32 2147483647, %v3069_v22  ;;  %v872_v30 = vor.u32 4788187, %v871_v21  ;;  %v875_v28 = vcvt.s32.f32 %v868_v9  ;;  %v942_v53 = vsel %vm930_vm5, %v924_v54, %v941_v57 }
 0x12c   : > { %v687_v38 = vsel %vm685_vm13, %v686_v2, %v2638_v6  ;;  %v943_v32 = vsel %vm929_vm3, %v940_v3, %v942_v53  ;;  %v3392_v15 = vmul.u32.u64.low %v3318_v23, %v939_v62  ;;  %v3393_v33 = vmul.u32.u64.high %v3318_v23, %v939_v62, %v3392_v15 }
 0x12d   : > { %vm3381_vm7 = vcmp.le.f32.partialorder %v4690_v44, 0.7853982  ;;  %v684_v41 = vsel %vm682_vm15, %v2636_v59, %v683_v61  ;;  %v873_v24 = vand.u32 2147483647, %v872_v30  ;;  %v879_v46 = vsub.s32 4, %v3269_v20 }
 0x12e   : > { %v3400_v55 = vmul.u32.u64.low %v3318_v23, %v943_v32  ;;  %v3401_v63 = vmul.u32.u64.high %v3318_v23, %v943_v32, %v3400_v55  ;;  %v688_v54 = vsel %vm681_vm0, %v684_v41, %v687_v38  ;;  %v935_v60 = vsel %vm929_vm3, %v932_v36, %v934_v14 }
 0x12f   : > { %v1002_v18 = vand.u32 2139095040, %v3321_v37  ;;  %v689_v52 = vsel %vm679_vm2, nan, %v688_v54  ;;  %v876_v59 = vmul.f32 %v875_v28, %v873_v24  ;;  %v999_v9 = vand.u32 2147483647, %v3321_v37 }
 0x130   : > { %v455_v21 = vmul.f32 %v3029_v16, %v3395_v39  ;;  %v2299_v7 = vmul.f32 %v2634_v35, %v689_v52  ;;  %v2253_v19 = vsub.f32 0.0, %v3292_v47  ;;  %v954_v3 = vadd.s32 1, %v3393_v33 }
 0x131   : > { %v1003_v6 = vshrl.u32 %v1002_v18, 23  ;;  %v877_v2 = vxor.u32 2147483648, %v876_v59  ;;  %v574_v25 = vmul.f32 %v3072_v29, %v3302_v0  ;;  %v951_v36 = vmul.u32 %v3318_v23, %v935_v60 }
 0x132   : > { %vm953_vm8 = vc.u32 %v3401_v63, %v3392_v15  ;;  %2315 = vst [vmem:[%s3365_s29] sm:$0xff] %v2299_v7  ;;  %v880_v40 = vsel %vm795_vm6, %v879_v46, %v3269_v20  ;;  %v486_v47 = vadd.f32 %v3305_v12, %v2974_v45  ;;  %v1006_v0 = vand.u32 8388607, %v999_v9 }
 0x133   : > { %v955_v35 = vsel %vm953_vm8, %v954_v3, %v3393_v33  ;;  %v2445_v14 = vadd.s32 4294967169, %v1003_v6  ;;  %v878_v62 = vsel %vm795_vm6, %v877_v2, %v876_v59  ;;  %v487_v23 = vadd.f32 %v455_v21, %v2966_v42 }
 0x134   : > { %v956_v57 = vadd.s32 %v955_v35, %v951_v36  ;;  %v881_v61 = vsel %vm3381_vm7, %v3069_v22, %v878_v62  ;;  %v882_v44 = vsel %vm3381_vm7, 0, %v880_v40  ;;  %v2271_v45 = vmul.f32 1.442695, %v2253_v19 }
 0x135   : > { %v1009_v20 = vadd.s32 1, %v2445_v14  ;;  %2639 = vcosq.f32 %v881_v61  ;;  %v3437_v30 = vmul.f32 %v574_v25, %v574_v25  ;;  %v530_v28 = vadd.f32 %v3065_v10, %v486_v47 }
 0x136   : > { %v957_v12 = vadd.s32 536870912, %v956_v57  ;;  %2641 = vsinq.f32 %v881_v61  ;;  %v1007_v42 = vor.u32 8388608, %v1006_v0  ;;  %v531_v32 = vadd.f32 %v3035_v17, %v487_v23 }
 0x137   : > { %vm1010_vm9 = vcmp.gt.s32.totalorder %v1009_v20, 0  ;;  %v3443_v33 = vand.u32 3, %v882_v44  ;;  %2643 = vpow2.f32 %v2271_v45  ;;  %v2254_v24 = vsub.f32 0.0, %v3437_v30 }
 0x138   : > { %v3440_v53 = vshrl.u32 %v957_v12, 30  ;;  %v1011_v38 = vsel %vm1010_vm9, %v1009_v20, 0  ;;  %v3448_v55 = vmul.f32 %v3072_v29, %v530_v28  ;;  %v3451_v46 = vadd.s32 %v3392_v15, %v3401_v63 }
 0x139   : > { %v1013_v41 = vand.u32 31, %v1011_v38  ;;  %v3455_v18 = vshll.u32 %v1007_v42, 8  ;;  %v3458_v52 = vmul.f32 %v3039_v26, %v531_v32  ;;  %vm891_vm10 = vcmp.eq.s32.totalorder %v3443_v33, 2 }
 0x13a   : > { %v959_v31 = vshll.u32 %v3440_v53, 30  ;;  %v3461_v59 = vshrl.u32 %v1011_v38, 5  ;;  %vm888_vm11 = vcmp.eq.s32.totalorder %v3443_v33, 0  ;;  %vm887_vm12 = vcmp.lt.s32.totalorder %v3443_v33, 2 }
 0x13b   : > { %v1014_v54 = vsub.s32 32, %v1013_v41  ;;  %v1016_v21 = vshll.u32 %v4677_v58, %v1013_v41  ;;  %v1019_v63 = vshll.u32 %v4678_v11, %v1013_v41  ;;  %v1022_v2 = vshll.u32 %v4679_v13, %v1013_v41 }
 0x13c   : > { %v3453_v60 = vsub.s32 %v956_v57, %v959_v31  ;;  %v1025_v25 = vshll.u32 %v4680_v8, %v1013_v41  ;;  %v1028_v36 = vshll.u32 %v4681_v1, %v1013_v41  ;;  %vm885_vm13 = vweird.f32 %v3069_v22 }
 0x13d   : > { %v1017_v7 = vshrl.u32 %v4678_v11, %v1014_v54  ;;  %v1020_v19 = vshrl.u32 %v4679_v13, %v1014_v54  ;;  %v1023_v3 = vshrl.u32 %v4680_v8, %v1014_v54  ;;  %v1026_v6 = vshrl.u32 %v4681_v1, %v1014_v54 }
 0x13e   : > { %v962_v15 = vsub.s32 0, %v3453_v60  ;;  %v1029_v40 = vshrl.u32 %v4682_v5, %v1014_v54  ;;  %v1102_v62 = vand.u32 2147483647, %v3458_v52  ;;  %v1105_v61 = vand.u32 2139095040, %v3458_v52 }
 0x13f   : > { %v1018_v47 = vor.u32 %v1017_v7, %v1016_v21  ;;  %v1021_v14 = vor.u32 %v1020_v19, %v1019_v63  ;;  %v1024_v57 = vor.u32 %v1023_v3, %v1022_v2  ;;  %v1027_v0 = vor.u32 %v1026_v6, %v1025_v25 }
 0x140   : > { %v2442_v35 = vmin.u32 %v962_v15, %v3453_v60  ;;  %v1030_v23 = vor.u32 %v1029_v40, %v1028_v36  ;;  %v1015_v44 = vshrl.u32 %v4677_v58, %v1014_v54  ;;  %vm1031_vm14 = vcmp.lt.s32.totalorder %v3461_v59, 1 }
 0x141   : > { %vm1034_vm15 = vcmp.lt.s32.totalorder %v3461_v59, 4  ;;  %vm1032_vm0 = vcmp.lt.s32.totalorder %v3461_v59, 2  ;;  %vm1033_vm1 = vcmp.lt.s32.totalorder %v3461_v59, 3  ;;  %v1043_v31 = vsel %vm1031_vm14, %v1021_v14, %v1024_v57 }
 0x142   : > { %v964_v20 = vclz %v2442_v35  ;;  %v2640_v45 = vpop.eup %2639  ;;  %v1036_v12 = vsel %vm1034_vm15, %v1024_v57, 2102212464  ;;  %v1040_v28 = vsel %vm1034_vm15, %v1027_v0, 920167782  ;;  %v1035_v41 = vsel %vm1031_vm14, %v1015_v44, %v1018_v47 }
 0x143   : > { %v2642_v42 = vpop.eup %2641  ;;  %v892_v38 = vxor.u32 2147483648, %v2640_v45  ;;  %v1039_v7 = vsel %vm1031_vm14, %v1018_v47, %v1021_v14  ;;  %v1041_v19 = vsel %vm1033_vm1, %v1024_v57, %v1040_v28  ;;  %v1044_v54 = vsel %vm1034_vm15, %v1030_v23, 1326507024 }
 0x144   : > { %v2443_v32 = vadd.s32 4294967294, %v964_v20  ;;  %v889_v21 = vxor.u32 2147483648, %v2642_v42  ;;  %v1037_v63 = vsel %vm1033_vm1, %v1021_v14, %v1036_v12  ;;  %v1045_v3 = vsel %vm1033_vm1, %v1027_v0, %v1044_v54  ;;  %v2644_v40 = vpop.eup %2643 }
 0x145   : > { %v893_v15 = vsel %vm891_vm10, %v892_v38, %v2642_v42  ;;  %v1046_v25 = vsel %vm1032_vm0, %v1043_v31, %v1045_v3  ;;  %v1106_v36 = vshrl.u32 %v1105_v61, 23  ;;  %v1042_v23 = vsel %vm1032_vm0, %v1039_v7, %v1041_v19  ;;  %v3517_v7 = vpop.permute.xlu1 %388 }
 0x146   : > { %vm2444_vm2 = vcmp.lt.s32.totalorder %v2443_v32, 0  ;;  %v890_v6 = vsel %vm888_vm11, %v2640_v45, %v889_v21  ;;  %v3498_v0 = vmul.u32.u64.low %v3455_v18, %v1046_v25  ;;  %v3499_v20 = vmul.u32.u64.high %v3455_v18, %v1046_v25, %v3498_v0 }
 0x147   : > { %v967_v2 = vsel %vm2444_vm2, 0, %v2443_v32  ;;  %v894_v35 = vsel %vm887_vm12, %v890_v6, %v893_v15  ;;  %v2449_v44 = vadd.s32 4294967169, %v1106_v36  ;;  %v456_v22 = vmul.f32 %v2944_v27, %v3395_v39 }
 0x148   : > { %v968_v47 = vsub.s32 32, %v967_v2  ;;  %v972_v57 = vsub.s32 4294967266, %v967_v2  ;;  %v895_v14 = vsel %vm885_vm13, nan, %v894_v35  ;;  %v969_v61 = vshll.u32 %v3453_v60, %v967_v2 }
 0x149   : > { %v2301_v45 = vmul.f32 %v2644_v40, %v895_v14  ;;  %v3504_v28 = vmul.u32.u64.low %v3455_v18, %v1042_v23  ;;  %v3505_v42 = vmul.u32.u64.high %v3455_v18, %v1042_v23, %v3504_v28  ;;  %v1112_v38 = vadd.s32 1, %v2449_v44 }
 0x14a   : > { %v970_v12 = vshrl.u32 %v3451_v46, %v968_v47  ;;  %v973_v33 = vadd.s32 127, %v972_v57  ;;  %vm898_vm3 = vcmp.lt.s32.totalorder %v3243_v34, 0  ;;  %v982_v21 = vsub.s32 4, %v3440_v53 }
 0x14b   : > { %2317 = vst [vmem:[%s3365_s29 + $0x10] sm:$0xff] %v2301_v45  ;;  %v1038_v46 = vsel %vm1032_vm0, %v1035_v41, %v1037_v63  ;;  %v1109_v60 = vand.u32 8388607, %v1102_v62  ;;  %vm1113_vm4 = vcmp.gt.s32.totalorder %v1112_v38, 0  ;;  %vm3521_vm5 = vcmp.le.f32.partialorder %v896_v4, 0.7853982 }
 0x14c   : > { %v971_v32 = vor.u32 %v970_v12, %v969_v61  ;;  %v974_v31 = vshll.u32 %v973_v33, 23  ;;  %v2273_v54 = vmul.f32 1.442695, %v2254_v24  ;;  %vm1056_vm6 = vc.u32 %v3499_v20, %v3504_v28 }
 0x14d   : > { %v1114_v59 = vsel %vm1113_vm4, %v1112_v38, 0  ;;  %v1057_v41 = vadd.s32 1, %v3505_v42  ;;  %v3532_v15 = vmul.f32 %v3448_v55, %v3448_v55  ;;  %v488_v63 = vadd.f32 %v456_v22, %v2969_v43 }
 0x14e   : > { %v975_v19 = vor.u32 4788187, %v974_v31  ;;  %v1116_v4 = vand.u32 31, %v1114_v59  ;;  %v978_v6 = vcvt.s32.f32 %v971_v32  ;;  %v1054_v2 = vmul.u32 %v3455_v18, %v1038_v46 }
 0x14f   : > { %v457_v30 = vmul.f32 %v3029_v16, %v3517_v7  ;;  %v983_v24 = vsel %vm898_vm3, %v982_v21, %v3440_v53  ;;  %v1058_v25 = vsel %vm1056_vm6, %v1057_v41, %v3505_v42  ;;  %v1110_v36 = vor.u32 8388608, %v1109_v60 }
 0x150   : > { %v976_v3 = vand.u32 2147483647, %v975_v19  ;;  %v1117_v40 = vsub.s32 32, %v1116_v4  ;;  %v1059_v35 = vadd.s32 %v1058_v25, %v1054_v2  ;;  %v3542_v47 = vshrl.u32 %v1114_v59, 5 }
 0x151   : > { %v1119_v43 = vshll.u32 %v4677_v58, %v1116_v4  ;;  %v1122_v18 = vshll.u32 %v4678_v11, %v1116_v4  ;;  %v1128_v44 = vshll.u32 %v4680_v8, %v1116_v4  ;;  %v1125_v33 = vshll.u32 %v4679_v13, %v1116_v4 }
 0x152   : > { %v979_v55 = vmul.f32 %v978_v6, %v976_v3  ;;  %v1120_v57 = vshrl.u32 %v4678_v11, %v1117_v40  ;;  %v1123_v23 = vshrl.u32 %v4679_v13, %v1117_v40  ;;  %v1126_v14 = vshrl.u32 %v4680_v8, %v1117_v40 }
 0x153   : > { %v1060_v53 = vadd.s32 536870912, %v1059_v35  ;;  %v1129_v45 = vshrl.u32 %v4681_v1, %v1117_v40  ;;  %v1132_v42 = vshrl.u32 %v4682_v5, %v1117_v40  ;;  %v1131_v31 = vshll.u32 %v4681_v1, %v1116_v4 }
 0x154   : > { %v980_v0 = vxor.u32 2147483648, %v979_v55  ;;  %v1121_v61 = vor.u32 %v1120_v57, %v1119_v43  ;;  %v1124_v12 = vor.u32 %v1123_v23, %v1122_v18  ;;  %v532_v46 = vadd.f32 %v3065_v10, %v488_v63 }
 0x155   : > { %v3555_v38 = vshrl.u32 %v1060_v53, 30  ;;  %v1130_v32 = vor.u32 %v1129_v45, %v1128_v44  ;;  %v1127_v60 = vor.u32 %v1126_v14, %v1125_v33  ;;  %v489_v19 = vadd.f32 %v457_v30, %v2981_v50 }
 0x156   : > { %v981_v22 = vsel %vm898_vm3, %v980_v0, %v979_v55  ;;  %v1133_v41 = vor.u32 %v1132_v42, %v1131_v31  ;;  %vm1134_vm7 = vcmp.lt.s32.totalorder %v3542_v47, 1  ;;  %v985_v3 = vsel %vm3521_vm5, 0, %v983_v24 }
 0x157   : > { %v984_v21 = vsel %vm3521_vm5, %v3243_v34, %v981_v22  ;;  %v1062_v59 = vshll.u32 %v3555_v38, 30  ;;  %vm1137_vm8 = vcmp.lt.s32.totalorder %v3542_v47, 4  ;;  %v1142_v4 = vsel %vm1134_vm7, %v1121_v61, %v1124_v12 }
 0x158   : > { %2645 = vcosq.f32 %v984_v21  ;;  %vm1136_vm9 = vcmp.lt.s32.totalorder %v3542_v47, 3  ;;  %v1143_v50 = vsel %vm1137_vm8, %v1130_v32, 920167782  ;;  %v1150_v63 = vshll.u32 %v1110_v36, 8 }
 0x159   : > { %2647 = vsinq.f32 %v984_v21  ;;  %v3570_v6 = vsub.s32 %v1059_v35, %v1062_v59  ;;  %vm1135_vm10 = vcmp.lt.s32.totalorder %v3542_v47, 2  ;;  %v1139_v2 = vsel %vm1137_vm8, %v1127_v60, 2102212464 }
 0x15a   : > { %v1144_v30 = vsel %vm1136_vm9, %v1127_v60, %v1143_v50  ;;  %v533_v39 = vadd.f32 %v3035_v17, %v489_v19  ;;  %v1146_v55 = vsel %vm1134_vm7, %v1124_v12, %v1127_v60  ;;  %v1147_v35 = vsel %vm1137_vm8, %v1133_v41, 1326507024  ;;  %v3612_v60 = vpop.permute.xlu0 %392 }
 0x15b   : > { %v1065_v24 = vsub.s32 0, %v3570_v6  ;;  %v1145_v25 = vsel %vm1135_vm10, %v1142_v4, %v1144_v30  ;;  %v1118_v43 = vshrl.u32 %v4677_v58, %v1117_v40  ;;  %v1148_v36 = vsel %vm1136_vm9, %v1130_v32, %v1147_v35 }
 0x15c   : > { %v3585_v57 = vmul.u32.u64.low %v1150_v63, %v1145_v25  ;;  %v3586_v18 = vmul.u32.u64.high %v1150_v63, %v1145_v25, %v3585_v57  ;;  %v989_v23 = vand.u32 3, %v985_v3  ;;  %2649 = vpow2.f32 %v2273_v54 }
 0x15d   : > { %v2446_v14 = vmin.u32 %v1065_v24, %v3570_v6  ;;  %v2255_v0 = vsub.f32 0.0, %v3532_v15  ;;  %v1138_v53 = vsel %vm1134_vm7, %v1118_v43, %v1121_v61  ;;  %v1140_v44 = vsel %vm1136_vm9, %v1124_v12, %v1139_v2 }
 0x15e   : > { %v1149_v40 = vsel %vm1135_vm10, %v1146_v55, %v1148_v36  ;;  %v3598_v45 = vmul.f32 %v3039_v26, %v533_v39  ;;  %v576_v42 = vmul.f32 %v3072_v29, %v532_v46  ;;  %v1160_v15 = vadd.s32 1, %v3586_v18 }
 0x15f   : > { %v1067_v33 = vclz %v2446_v14  ;;  %v3601_v54 = vmul.u32.u64.low %v1150_v63, %v1149_v40  ;;  %v3602_v22 = vmul.u32.u64.high %v1150_v63, %v1149_v40, %v3601_v54  ;;  %vm988_vm11 = vweird.f32 %v3243_v34 }
 0x160   : > { %v1208_v32 = vand.u32 2139095040, %v3598_v45  ;;  %vm1001_vm12 = vcmp.lt.s32.totalorder %v3321_v37, 0  ;;  %v2275_v12 = vmul.f32 1.442695, %v2255_v0  ;;  %v1141_v31 = vsel %vm1135_vm10, %v1138_v53, %v1140_v44 }
 0x161   : > { %v2447_v61 = vadd.s32 4294967294, %v1067_v33  ;;  %v458_v21 = vmul.f32 %v2944_v27, %v3517_v7  ;;  %vm990_vm13 = vcmp.lt.s32.totalorder %v989_v23, 2  ;;  %vm991_vm14 = vcmp.eq.s32.totalorder %v989_v23, 0 }
 0x162   : > { %vm994_vm15 = vcmp.eq.s32.totalorder %v989_v23, 2  ;;  %v1209_v46 = vshrl.u32 %v1208_v32, 23  ;;  %v1055_v19 = vadd.s32 %v3504_v28, %v3499_v20  ;;  %vm1159_vm1 = vc.u32 %v3602_v22, %v3585_v57 }
 0x163   : > { %vm2448_vm0 = vcmp.lt.s32.totalorder %v2447_v61, 0  ;;  %v3618_v59 = vmul.f32 %v576_v42, %v576_v42  ;;  %v1157_v3 = vmul.u32 %v1150_v63, %v1141_v31  ;;  %v1161_v7 = vsel %vm1159_vm1, %v1160_v15, %v3586_v18 }
 0x164   : > { %v1070_v41 = vsel %vm2448_vm0, 0, %v2447_v61  ;;  %v2453_v4 = vadd.s32 4294967169, %v1209_v46  ;;  %v459_v24 = vmul.f32 %v3029_v16, %v3612_v60  ;;  %v1085_v28 = vsub.s32 4, %v3555_v38 }
 0x165   : > { %v2646_v47 = vpop.eup %2645  ;;  %v1071_v30 = vsub.s32 32, %v1070_v41  ;;  %v1075_v39 = vsub.s32 4294967266, %v1070_v41  ;;  %v1162_v25 = vadd.s32 %v1161_v7, %v1157_v3  ;;  %v1072_v43 = vshll.u32 %v3570_v6, %v1070_v41 }
 0x166   : > { %v2648_v50 = vpop.eup %2647  ;;  %v995_v2 = vxor.u32 2147483648, %v2646_v47  ;;  %v1215_v55 = vadd.s32 1, %v2453_v4  ;;  %v1205_v0 = vand.u32 2147483647, %v3598_v45  ;;  %v3634_v6 = vsel %vm1001_vm12, %v1085_v28, %v3555_v38 }
 0x167   : > { %v992_v20 = vxor.u32 2147483648, %v2648_v50  ;;  %v1073_v63 = vshrl.u32 %v1055_v19, %v1071_v30  ;;  %v1076_v36 = vadd.s32 127, %v1075_v39  ;;  %v1163_v14 = vadd.s32 536870912, %v1162_v25 }
 0x168   : > { %v996_v35 = vsel %vm994_vm15, %v995_v2, %v2648_v50  ;;  %vm1216_vm2 = vcmp.gt.s32.totalorder %v1215_v55, 0  ;;  %vm3640_vm3 = vcmp.le.f32.partialorder %v999_v9, 0.7853982  ;;  %2651 = vpow2.f32 %v2275_v12 }
 0x169   : > { %v993_v18 = vsel %vm991_vm14, %v2646_v47, %v992_v20  ;;  %v1074_v44 = vor.u32 %v1073_v63, %v1072_v43  ;;  %v1077_v40 = vshll.u32 %v1076_v36, 23  ;;  %v1217_v33 = vsel %vm1216_vm2, %v1215_v55, 0  ;;  %v2650_v42 = vpop.eup %2649 }
 0x16a   : > { %v997_v53 = vsel %vm990_vm13, %v993_v18, %v996_v35  ;;  %v3636_v15 = vshrl.u32 %v1163_v14, 30  ;;  %v1219_v32 = vand.u32 31, %v1217_v33  ;;  %v2256_v46 = vsub.f32 0.0, %v3618_v59 }
 0x16b   : > { %v998_v54 = vsel %vm988_vm11, nan, %v997_v53  ;;  %v1078_v31 = vor.u32 4788187, %v1077_v40  ;;  %v3647_v19 = vadd.f32 %v458_v21, %v2984_v51  ;;  %v1081_v41 = vcvt.s32.f32 %v1074_v44 }
 0x16c   : > { %v2302_v61 = vmul.f32 %v2650_v42, %v998_v54  ;;  %v1165_v34 = vshll.u32 %v3636_v15, 30  ;;  %v1220_v38 = vsub.s32 32, %v1219_v32  ;;  %v1088_v9 = vsel %vm3640_vm3, 0, %v3634_v6 }
 0x16d   : > { %v1079_v47 = vand.u32 2147483647, %v1078_v31  ;;  %v1212_v3 = vand.u32 8388607, %v1205_v0  ;;  %v1158_v12 = vadd.s32 %v3585_v57, %v3602_v22  ;;  %v491_v51 = vadd.f32 %v459_v24, %v2976_v48 }
 0x16e   : > { %2318 = vst [vmem:[%s3365_s29 + $0x18] sm:$0xff] %v2302_v61  ;;  %v3657_v7 = vsub.s32 %v1162_v25, %v1165_v34  ;;  %v1223_v4 = vshrl.u32 %v4678_v11, %v1220_v38  ;;  %v1222_v50 = vshll.u32 %v4677_v58, %v1219_v32  ;;  %v1226_v2 = vshrl.u32 %v4679_v13, %v1220_v38 }
 0x16f   : > { %v1082_v21 = vmul.f32 %v1081_v41, %v1079_v47  ;;  %v1229_v30 = vshrl.u32 %v4680_v8, %v1220_v38  ;;  %v1225_v20 = vshll.u32 %v4678_v11, %v1219_v32  ;;  %v1228_v28 = vshll.u32 %v4679_v13, %v1219_v32 }
 0x170   : > { %v1168_v39 = vsub.s32 0, %v3657_v7  ;;  %v1232_v57 = vshrl.u32 %v4681_v1, %v1220_v38  ;;  %v1213_v25 = vor.u32 8388608, %v1212_v3  ;;  %v1218_v55 = vshrl.u32 %v1217_v33, 5 }
 0x171   : > { %v1083_v22 = vxor.u32 2147483648, %v1082_v21  ;;  %v1231_v48 = vshll.u32 %v4680_v8, %v1219_v32  ;;  %v1224_v35 = vor.u32 %v1223_v4, %v1222_v50  ;;  %v1227_v43 = vor.u32 %v1226_v2, %v1225_v20 }
 0x172   : > { %v2450_v24 = vmin.u32 %v1168_v39, %v3657_v7  ;;  %v1230_v63 = vor.u32 %v1229_v30, %v1228_v28  ;;  %v1234_v14 = vshll.u32 %v4681_v1, %v1219_v32  ;;  %v1235_v53 = vshrl.u32 %v4682_v5, %v1220_v38 }
 0x173   : > { %v1084_v36 = vsel %vm1001_vm12, %v1083_v22, %v1082_v21  ;;  %v1233_v18 = vor.u32 %v1232_v57, %v1231_v48  ;;  %v1221_v33 = vshrl.u32 %v4677_v58, %v1220_v38  ;;  %v535_v42 = vadd.f32 %v3035_v17, %v491_v51 }
 0x174   : > { %v1087_v44 = vsel %vm3640_vm3, %v3321_v37, %v1084_v36  ;;  %v1170_v40 = vclz %v2450_v24  ;;  %v1236_v54 = vor.u32 %v1235_v53, %v1234_v14  ;;  %vm1237_vm4 = vcmp.lt.s32.totalorder %v1218_v55, 1 }
 0x175   : > { %2653 = vcosq.f32 %v1087_v44  ;;  %vm1239_vm5 = vcmp.lt.s32.totalorder %v1218_v55, 3  ;;  %vm1240_vm6 = vcmp.lt.s32.totalorder %v1218_v55, 4  ;;  %v1245_v32 = vsel %vm1237_vm4, %v1224_v35, %v1227_v43  ;;  %v3681_v47 = vpop.eup %2651 }
 0x176   : > { %2655 = vsinq.f32 %v1087_v44  ;;  %v2451_v6 = vadd.s32 4294967294, %v1170_v40  ;;  %v1242_v61 = vsel %vm1240_vm6, %v1230_v63, 2102212464  ;;  %v1246_v31 = vsel %vm1240_vm6, %v1233_v18, 920167782 }
 0x177   : > { %v1249_v34 = vsel %vm1237_vm4, %v1227_v43, %v1230_v63  ;;  %v1250_v23 = vsel %vm1240_vm6, %v1236_v54, 1326507024  ;;  %vm1238_vm8 = vcmp.lt.s32.totalorder %v1218_v55, 2  ;;  %v1247_v38 = vsel %vm1239_vm5, %v1230_v63, %v1246_v31 }
 0x178   : > { %vm2452_vm7 = vcmp.lt.s32.totalorder %v2451_v6, 0  ;;  %v1251_v41 = vsel %vm1239_vm5, %v1233_v18, %v1250_v23  ;;  %v1248_v4 = vsel %vm1238_vm8, %v1245_v32, %v1247_v38  ;;  %v1253_v21 = vshll.u32 %v1213_v25, 8 }
 0x179   : > { %v1173_v3 = vsel %vm2452_vm7, 0, %v2451_v6  ;;  %v1252_v51 = vsel %vm1238_vm8, %v1249_v34, %v1251_v41  ;;  %v1241_v30 = vsel %vm1237_vm4, %v1221_v33, %v1224_v35  ;;  %v1243_v39 = vsel %vm1239_vm5, %v1227_v43, %v1242_v61 }
 0x17a   : > { %v1174_v50 = vsub.s32 32, %v1173_v3  ;;  %v1178_v2 = vsub.s32 4294967266, %v1173_v3  ;;  %v3689_v20 = vmul.u32.u64.low %v1253_v21, %v1252_v51  ;;  %v3690_v28 = vmul.u32.u64.high %v1253_v21, %v1252_v51, %v3689_v20 }
 0x17b   : > { %v3692_v57 = vmul.u32.u64.low %v1253_v21, %v1248_v4  ;;  %v3693_v22 = vmul.u32.u64.high %v1253_v21, %v1248_v4, %v3692_v57  ;;  %v1175_v48 = vshll.u32 %v3657_v7, %v1173_v3  ;;  %v3698_v36 = vmul.f32 %v3039_v26, %v535_v42  ;;  %v3710_v7 = vpop.permute.xlu1 %396 }
 0x17c   : > { %v1176_v24 = vshrl.u32 %v1158_v12, %v1174_v50  ;;  %v1179_v63 = vadd.s32 127, %v1178_v2  ;;  %v1092_v25 = vand.u32 3, %v1088_v9  ;;  %vm1104_vm9 = vcmp.lt.s32.totalorder %v3458_v52, 0 }
 0x17d   : > { %v1244_v35 = vsel %vm1238_vm8, %v1241_v30, %v1243_v39  ;;  %vm3704_vm10 = vcmp.le.f32.partialorder %v1102_v62, 0.7853982  ;;  %v2277_v12 = vmul.f32 1.442695, %v2256_v46  ;;  %vm1091_vm11 = vweird.f32 %v3321_v37 }
 0x17e   : > { %v1177_v18 = vor.u32 %v1176_v24, %v1175_v48  ;;  %v1180_v14 = vshll.u32 %v1179_v63, 23  ;;  %v1188_v9 = vsub.s32 4, %v3636_v15  ;;  %vm1262_vm12 = vc.u32 %v3690_v28, %v3692_v57 }
 0x17f   : > { %v1263_v55 = vadd.s32 1, %v3693_v22  ;;  %v1311_v62 = vand.u32 2139095040, %v3698_v36  ;;  %v534_v44 = vadd.f32 %v3065_v10, %v3647_v19  ;;  %v1260_v40 = vmul.u32 %v1253_v21, %v1244_v35 }
 0x180   : > { %v1181_v53 = vor.u32 4788187, %v1180_v14  ;;  %v1308_v59 = vand.u32 2147483647, %v3698_v36  ;;  %vm1093_vm13 = vcmp.lt.s32.totalorder %v1092_v25, 2  ;;  %v461_v42 = vmul.f32 %v3029_v16, %v3710_v7 }
 0x181   : > { %v1264_v46 = vsel %vm1262_vm12, %v1263_v55, %v3693_v22  ;;  %v1312_v33 = vshrl.u32 %v1311_v62, 23  ;;  %vm1094_vm14 = vcmp.eq.s32.totalorder %v1092_v25, 0  ;;  %v1184_v32 = vcvt.s32.f32 %v1177_v18 }
 0x182   : > { %v2654_v54 = vpop.eup %2653  ;;  %v1182_v6 = vand.u32 2147483647, %v1181_v53  ;;  %v1265_v61 = vadd.s32 %v1264_v46, %v1260_v40  ;;  %vm1097_vm15 = vcmp.eq.s32.totalorder %v1092_v25, 2  ;;  %v1189_v19 = vsel %vm1104_vm9, %v1188_v9, %v3636_v15 }
 0x183   : > { %v2656_v31 = vpop.eup %2655  ;;  %v1098_v34 = vxor.u32 2147483648, %v2654_v54  ;;  %v2457_v23 = vadd.s32 4294967169, %v1312_v33  ;;  %v1315_v4 = vand.u32 8388607, %v1308_v59  ;;  %2657 = vpow2.f32 %v2277_v12 }
 0x184   : > { %v1095_v38 = vxor.u32 2147483648, %v2656_v31  ;;  %v1185_v41 = vmul.f32 %v1184_v32, %v1182_v6  ;;  %v1266_v3 = vadd.s32 536870912, %v1265_v61  ;;  %v493_v50 = vadd.f32 %v461_v42, %v2991_v56 }
 0x185   : > { %v1099_v51 = vsel %vm1097_vm15, %v1098_v34, %v2656_v31  ;;  %v1318_v21 = vadd.s32 1, %v2457_v23  ;;  %v577_v39 = vmul.f32 %v3072_v29, %v534_v44  ;;  %v1191_v22 = vsel %vm3704_vm10, 0, %v1189_v19 }
 0x186   : > { %v1096_v2 = vsel %vm1094_vm14, %v2654_v54, %v1095_v38  ;;  %v1186_v30 = vxor.u32 2147483648, %v1185_v41  ;;  %v3732_v20 = vshrl.u32 %v1266_v3, 30  ;;  %v460_v48 = vmul.f32 %v2944_v27, %v3612_v60 }
 0x187   : > { %v1100_v15 = vsel %vm1093_vm13, %v1096_v2, %v1099_v51  ;;  %vm1319_vm0 = vcmp.gt.s32.totalorder %v1318_v21, 0  ;;  %v1316_v35 = vor.u32 8388608, %v1315_v4  ;;  %v537_v12 = vadd.f32 %v3035_v17, %v493_v50 }
 0x188   : > { %v1101_v56 = vsel %vm1091_vm11, nan, %v1100_v15  ;;  %v1187_v24 = vsel %vm1104_vm9, %v1186_v30, %v1185_v41  ;;  %v1268_v63 = vshll.u32 %v3732_v20, 30  ;;  %v1320_v14 = vsel %vm1319_vm0, %v1318_v21, 0 }
 0x189   : > { %v2303_v25 = vmul.f32 %v3681_v47, %v1101_v56  ;;  %v1190_v18 = vsel %vm3704_vm10, %v3458_v52, %v1187_v24  ;;  %v3751_v37 = vshrl.u32 %v1320_v14, 5  ;;  %v1322_v9 = vand.u32 31, %v1320_v14 }
 0x18a   : > { %2659 = vcosq.f32 %v1190_v18  ;;  %v3749_v60 = vsub.s32 %v1265_v61, %v1268_v63  ;;  %v3754_v55 = vand.u32 3, %v1191_v22  ;;  %v3757_v47 = vmul.f32 %v577_v39, %v577_v39 }
 0x18b   : > { %2319 = vst [vmem:[%s3365_s29 + $0x20] sm:$0xff] %v2303_v25  ;;  %2661 = vsinq.f32 %v1190_v18  ;;  %v3760_v43 = vadd.f32 %v460_v48, %v2979_v49  ;;  %v1261_v53 = vadd.s32 %v3692_v57, %v3690_v28  ;;  %v1323_v44 = vsub.s32 32, %v1322_v9 }
 0x18c   : > { %v1271_v62 = vsub.s32 0, %v3749_v60  ;;  %v3764_v40 = vshll.u32 %v1316_v35, 8  ;;  %v3767_v46 = vmul.f32 %v3039_v26, %v537_v12  ;;  %v1325_v42 = vshll.u32 %v4677_v58, %v1322_v9 }
 0x18d   : > { %v1328_v54 = vshll.u32 %v4678_v11, %v1322_v9  ;;  %vm1340_vm1 = vcmp.lt.s32.totalorder %v3751_v37, 1  ;;  %v1326_v49 = vshrl.u32 %v4678_v11, %v1323_v44  ;;  %v1329_v6 = vshrl.u32 %v4679_v13, %v1323_v44 }
 0x18e   : > { %v2454_v33 = vmin.u32 %v1271_v62, %v3749_v60  ;;  %v1331_v28 = vshll.u32 %v4679_v13, %v1322_v9  ;;  %v1332_v57 = vshrl.u32 %v4680_v8, %v1323_v44  ;;  %v1334_v61 = vshll.u32 %v4680_v8, %v1322_v9 }
 0x18f   : > { %v1335_v31 = vshrl.u32 %v4681_v1, %v1323_v44  ;;  %v1337_v34 = vshll.u32 %v4681_v1, %v1322_v9  ;;  %v1327_v19 = vor.u32 %v1326_v49, %v1325_v42  ;;  %v1330_v23 = vor.u32 %v1329_v6, %v1328_v54 }
 0x190   : > { %v1273_v32 = vclz %v2454_v33  ;;  %v1333_v38 = vor.u32 %v1332_v57, %v1331_v28  ;;  %v1338_v41 = vshrl.u32 %v4682_v5, %v1323_v44  ;;  %v2658_v3 = vpop.eup %2657  ;;  %vm1197_vm2 = vcmp.eq.s32.totalorder %v3754_v55, 0 }
 0x191   : > { %v1324_v51 = vshrl.u32 %v4677_v58, %v1323_v44  ;;  %v1336_v21 = vor.u32 %v1335_v31, %v1334_v61  ;;  %vm1343_vm3 = vcmp.lt.s32.totalorder %v3751_v37, 4  ;;  %vm1341_vm4 = vcmp.lt.s32.totalorder %v3751_v37, 2 }
 0x192   : > { %v2455_v4 = vadd.s32 4294967294, %v1273_v32  ;;  %v1339_v50 = vor.u32 %v1338_v41, %v1337_v34  ;;  %v1345_v2 = vsel %vm1343_vm3, %v1333_v38, 2102212464  ;;  %v1348_v30 = vsel %vm1340_vm1, %v1327_v19, %v1330_v23 }
 0x193   : > { %vm1194_vm5 = vweird.f32 %v3458_v52  ;;  %vm1342_vm7 = vcmp.lt.s32.totalorder %v3751_v37, 3  ;;  %v1344_v39 = vsel %vm1340_vm1, %v1324_v51, %v1327_v19  ;;  %v1349_v15 = vsel %vm1343_vm3, %v1336_v21, 920167782 }
 0x194   : > { %vm2456_vm6 = vcmp.lt.s32.totalorder %v2455_v4, 0  ;;  %v1350_v48 = vsel %vm1342_vm7, %v1333_v38, %v1349_v15  ;;  %v1352_v56 = vsel %vm1340_vm1, %v1330_v23, %v1333_v38  ;;  %v1353_v24 = vsel %vm1343_vm3, %v1339_v50, 1326507024  ;;  %v3822_v50 = vpop.permute.xlu0 %400 }
 0x195   : > { %v1276_v22 = vsel %vm2456_vm6, 0, %v2455_v4  ;;  %v1346_v25 = vsel %vm1342_vm7, %v1330_v23, %v1345_v2  ;;  %v1351_v18 = vsel %vm1341_vm4, %v1348_v30, %v1350_v48  ;;  %v1354_v9 = vsel %vm1342_vm7, %v1336_v21, %v1353_v24 }
 0x196   : > { %v1277_v63 = vsub.s32 32, %v1276_v22  ;;  %v1281_v35 = vsub.s32 4294967266, %v1276_v22  ;;  %v1278_v12 = vshll.u32 %v3749_v60, %v1276_v22  ;;  %v1355_v6 = vsel %vm1341_vm4, %v1352_v56, %v1354_v9 }
 0x197   : > { %v2660_v14 = vpop.eup %2659  ;;  %v3797_v62 = vmul.u32.u64.low %v3764_v40, %v1351_v18  ;;  %v3798_v44 = vmul.u32.u64.high %v3764_v40, %v1351_v18, %v3797_v62  ;;  %vm1200_vm8 = vcmp.eq.s32.totalorder %v3754_v55, 2  ;;  %v1347_v34 = vsel %vm1341_vm4, %v1344_v39, %v1346_v25 }
 0x198   : > { %v2662_v33 = vpop.eup %2661  ;;  %v1201_v42 = vxor.u32 2147483648, %v2660_v14  ;;  %v1279_v54 = vshrl.u32 %v1261_v53, %v1277_v63  ;;  %v1282_v49 = vadd.s32 127, %v1281_v35  ;;  %vm1196_vm9 = vcmp.lt.s32.totalorder %v3754_v55, 2 }
 0x199   : > { %v1198_v28 = vxor.u32 2147483648, %v2662_v33  ;;  %v3805_v57 = vmul.u32.u64.low %v3764_v40, %v1355_v6  ;;  %v3806_v32 = vmul.u32.u64.high %v3764_v40, %v1355_v6, %v3805_v57  ;;  %v1366_v19 = vadd.s32 1, %v3798_v44 }
 0x19a   : > { %v1202_v60 = vsel %vm1200_vm8, %v1201_v42, %v2662_v33  ;;  %v1280_v61 = vor.u32 %v1279_v54, %v1278_v12  ;;  %v1283_v31 = vshll.u32 %v1282_v49, 23  ;;  %v1414_v23 = vand.u32 2139095040, %v3767_v46  ;;  %v4702_v57 = vld [vmem:[#allocation10_spill] sm:$0xff] }
 0x19b   : > { %v1199_v53 = vsel %vm1197_vm2, %v2660_v14, %v1198_v28  ;;  %v1291_v4 = vsub.s32 4, %v3732_v20  ;;  %v2257_v51 = vsub.f32 0.0, %v3757_v47  ;;  %v1363_v21 = vmul.u32 %v3764_v40, %v1347_v34 }
 0x19c   : > { %v1203_v38 = vsel %vm1196_vm9, %v1199_v53, %v1202_v60  ;;  %v1284_v41 = vor.u32 4788187, %v1283_v31  ;;  %vm1365_vm10 = vc.u32 %v3806_v32, %v3797_v62  ;;  %v1415_v55 = vshrl.u32 %v1414_v23, 23 }
 0x19d   : > { %v1204_v37 = vsel %vm1194_vm5, nan, %v1203_v38  ;;  %v1287_v39 = vcvt.s32.f32 %v1280_v61  ;;  %v1367_v15 = vsel %vm1365_vm10, %v1366_v19, %v3798_v44  ;;  %v536_v22 = vadd.f32 %v3065_v10, %v3760_v43 }
 0x19e   : > { %v2304_v2 = vmul.f32 %v2658_v3, %v1204_v37  ;;  %v1285_v30 = vand.u32 2147483647, %v1284_v41  ;;  %v1368_v47 = vadd.s32 %v1367_v15, %v1363_v21  ;;  %v2461_v48 = vadd.s32 4294967169, %v1415_v55 }
 0x19f   : > { %v1411_v40 = vand.u32 2147483647, %v3767_v46  ;;  %v463_v56 = vmul.f32 %v3029_v16, %v3822_v50  ;;  %vm1207_vm11 = vcmp.lt.s32.totalorder %v3598_v45, 0  ;;  %v2279_v24 = vmul.f32 1.442695, %v2257_v51 }
 0x1a0   : > { %2320 = vst [vmem:[%s3365_s29 + $0x28] sm:$0xff] %v2304_v2  ;;  %v1288_v52 = vmul.f32 %v1287_v39, %v1285_v30  ;;  %v1369_v3 = vadd.s32 536870912, %v1368_v47  ;;  %v1421_v63 = vadd.s32 1, %v2461_v48  ;;  %vm3834_vm12 = vcmp.le.f32.partialorder %v1205_v0, 0.7853982  ;;  %v4701_v0 = vld [vmem:[#allocation8_spill] sm:$0xff] }
 0x1a1   : > { %v1292_v25 = vsel %vm1207_vm11, %v1291_v4, %v3732_v20  ;;  %v578_v18 = vmul.f32 %v3072_v29, %v536_v22  ;;  %v462_v12 = vmul.f32 %v2944_v27, %v3710_v7  ;;  %v1418_v44 = vand.u32 8388607, %v1411_v40 }
 0x1a2   : > { %v1289_v43 = vxor.u32 2147483648, %v1288_v52  ;;  %v3840_v14 = vshrl.u32 %v1369_v3, 30  ;;  %vm1422_vm13 = vcmp.gt.s32.totalorder %v1421_v63, 0  ;;  %v495_v42 = vadd.f32 %v463_v56, %v4701_v0 }
 0x1a3   : > { %v1423_v33 = vsel %vm1422_vm13, %v1421_v63, 0  ;;  %v1294_v20 = vsel %vm3834_vm12, 0, %v1292_v25  ;;  %2663 = vpow2.f32 %v2279_v24  ;;  %v3855_v28 = vmul.f32 %v578_v18, %v578_v18 }
 0x1a4   : > { %v1290_v9 = vsel %vm1207_vm11, %v1289_v43, %v1288_v52  ;;  %v1371_v49 = vshll.u32 %v3840_v14, 30  ;;  %v1425_v7 = vand.u32 31, %v1423_v33  ;;  %v494_v60 = vadd.f32 %v462_v12, %v4702_v57 }
 0x1a5   : > { %v1293_v54 = vsel %vm3834_vm12, %v3598_v45, %v1290_v9  ;;  %v3858_v61 = vand.u32 3, %v1294_v20  ;;  %v1419_v31 = vor.u32 8388608, %v1418_v44  ;;  %v539_v53 = vadd.f32 %v3035_v17, %v495_v42 }
 0x1a6   : > { %2665 = vcosq.f32 %v1293_v54  ;;  %v3853_v6 = vsub.s32 %v1368_v47, %v1371_v49  ;;  %v1426_v34 = vsub.s32 32, %v1425_v7  ;;  %v3862_v23 = vshrl.u32 %v1423_v33, 5 }
 0x1a7   : > { %2667 = vsinq.f32 %v1293_v54  ;;  %v1428_v38 = vshll.u32 %v4677_v58, %v1425_v7  ;;  %v1431_v41 = vshll.u32 %v4678_v11, %v1425_v7  ;;  %v1434_v37 = vshll.u32 %v4679_v13, %v1425_v7 }
 0x1a8   : > { %v1374_v19 = vsub.s32 0, %v3853_v6  ;;  %v1429_v4 = vshrl.u32 %v4678_v11, %v1426_v34  ;;  %v1432_v51 = vshrl.u32 %v4679_v13, %v1426_v34  ;;  %v1435_v21 = vshrl.u32 %v4680_v8, %v1426_v34 }
 0x1a9   : > { %v1364_v55 = vadd.s32 %v3797_v62, %v3806_v32  ;;  %v538_v30 = vadd.f32 %v3065_v10, %v494_v60  ;;  %v1437_v39 = vshll.u32 %v4680_v8, %v1425_v7  ;;  %v1438_v48 = vshrl.u32 %v4681_v1, %v1426_v34 }
 0x1aa   : > { %v2458_v2 = vmin.u32 %v1374_v19, %v3853_v6  ;;  %v1430_v15 = vor.u32 %v1429_v4, %v1428_v38  ;;  %v1433_v22 = vor.u32 %v1432_v51, %v1431_v41  ;;  %v1436_v47 = vor.u32 %v1435_v21, %v1434_v37 }
 0x1ab   : > { %vm1303_vm14 = vcmp.eq.s32.totalorder %v3858_v61, 2  ;;  %v1440_v56 = vshll.u32 %v4681_v1, %v1425_v7  ;;  %v1441_v24 = vshrl.u32 %v4682_v5, %v1426_v34  ;;  %v3879_v3 = vshll.u32 %v1419_v31, 8 }
 0x1ac   : > { %v1376_v52 = vclz %v2458_v2  ;;  %vm1300_vm15 = vcmp.eq.s32.totalorder %v3858_v61, 0  ;;  %v1439_v62 = vor.u32 %v1438_v48, %v1437_v39  ;;  %vm1443_vm0 = vcmp.lt.s32.totalorder %v3862_v23, 1 }
 0x1ad   : > { %vm1446_vm1 = vcmp.lt.s32.totalorder %v3862_v23, 4  ;;  %v3885_v32 = vmul.f32 %v3039_v26, %v539_v53  ;;  %vm1299_vm2 = vcmp.lt.s32.totalorder %v3858_v61, 2  ;;  %v1427_v35 = vshrl.u32 %v4677_v58, %v1426_v34  ;;  %v3902_v53 = vpop.permute.xlu1 %404 }
 0x1ae   : > { %v2459_v63 = vadd.s32 4294967294, %v1376_v52  ;;  %v1442_v43 = vor.u32 %v1441_v24, %v1440_v56  ;;  %v1448_v25 = vsel %vm1446_vm1, %v1436_v47, 2102212464  ;;  %vm1297_vm3 = vweird.f32 %v3598_v45 }
 0x1af   : > { %vm1445_vm4 = vcmp.lt.s32.totalorder %v3862_v23, 3  ;;  %v1451_v18 = vsel %vm1443_vm0, %v1430_v15, %v1433_v22  ;;  %v1452_v12 = vsel %vm1446_vm1, %v1439_v62, 920167782  ;;  %v1455_v9 = vsel %vm1443_vm0, %v1433_v22, %v1436_v47 }
 0x1b0   : > { %vm2460_vm5 = vcmp.lt.s32.totalorder %v2459_v63, 0  ;;  %vm1444_vm6 = vcmp.lt.s32.totalorder %v3862_v23, 2  ;;  %v1453_v44 = vsel %vm1445_vm4, %v1436_v47, %v1452_v12  ;;  %v1456_v33 = vsel %vm1446_vm1, %v1442_v43, 1326507024  ;;  %v2664_v0 = vpop.eup %2663 }
 0x1b1   : > { %v1379_v42 = vsel %vm2460_vm5, 0, %v2459_v63  ;;  %v1447_v54 = vsel %vm1443_vm0, %v1427_v35, %v1430_v15  ;;  %v1449_v20 = vsel %vm1445_vm4, %v1433_v22, %v1448_v25  ;;  %v1457_v49 = vsel %vm1445_vm4, %v1439_v62, %v1456_v33 }
 0x1b2   : > { %v1380_v57 = vsub.s32 32, %v1379_v42  ;;  %v1384_v60 = vsub.s32 4294967266, %v1379_v42  ;;  %v1454_v31 = vsel %vm1444_vm6, %v1451_v18, %v1453_v44  ;;  %v1458_v34 = vsel %vm1444_vm6, %v1455_v9, %v1457_v49  ;;  %v4703_v44 = vld [vmem:[#allocation13_spill] sm:$0xff] }
 0x1b3   : > { %v2666_v7 = vpop.eup %2665  ;;  %v1381_v41 = vshll.u32 %v3853_v6, %v1379_v42  ;;  %v3906_v4 = vmul.u32.u64.low %v3879_v3, %v1458_v34  ;;  %v3907_v51 = vmul.u32.u64.high %v3879_v3, %v1458_v34, %v3906_v4  ;;  %v1517_v39 = vand.u32 2139095040, %v3885_v32 }
 0x1b4   : > { %v2668_v19 = vpop.eup %2667  ;;  %v1304_v38 = vxor.u32 2147483648, %v2666_v7  ;;  %v1382_v21 = vshrl.u32 %v1364_v55, %v1380_v57  ;;  %v1385_v2 = vadd.s32 127, %v1384_v60  ;;  %v465_v6 = vmul.f32 %v3029_v16, %v3902_v53  ;;  %v4706_v4 = vld [vmem:[#allocation9_spill] sm:$0xff] }
 0x1b5   : > { %v1301_v37 = vxor.u32 2147483648, %v2668_v19  ;;  %v3913_v22 = vmul.u32.u64.low %v3879_v3, %v1454_v31  ;;  %v3914_v47 = vmul.u32.u64.high %v3879_v3, %v1454_v31, %v3913_v22  ;;  %v1518_v55 = vshrl.u32 %v1517_v39, 23 }
 0x1b6   : > { %v1305_v15 = vsel %vm1303_vm14, %v1304_v38, %v2668_v19  ;;  %v1383_v52 = vor.u32 %v1382_v21, %v1381_v41  ;;  %v1386_v56 = vshll.u32 %v1385_v2, 23  ;;  %v2258_v62 = vsub.f32 0.0, %v3855_v28 }
 0x1b7   : > { %v1302_v48 = vsel %vm1300_vm15, %v2666_v7, %v1301_v37  ;;  %v579_v63 = vmul.f32 %v3072_v29, %v538_v30  ;;  %v1450_v35 = vsel %vm1444_vm6, %v1447_v54, %v1449_v20  ;;  %vm1468_vm7 = vc.u32 %v3907_v51, %v3913_v22 }
 0x1b8   : > { %v1306_v24 = vsel %vm1299_vm2, %v1302_v48, %v1305_v15  ;;  %v1387_v25 = vor.u32 4788187, %v1386_v56  ;;  %v2465_v18 = vadd.s32 4294967169, %v1518_v55  ;;  %v1394_v61 = vsub.s32 4, %v3840_v14 }
 0x1b9   : > { %v1307_v43 = vsel %vm1297_vm3, nan, %v1306_v24  ;;  %v1469_v9 = vadd.s32 1, %v3914_v47  ;;  %v497_v28 = vadd.f32 %v465_v6, %v4703_v44  ;;  %v1390_v30 = vcvt.s32.f32 %v1383_v52 }
 0x1ba   : > { %v2305_v12 = vmul.f32 %v2664_v0, %v1307_v43  ;;  %v1388_v33 = vand.u32 2147483647, %v1387_v25  ;;  %v1466_v23 = vmul.u32 %v3879_v3, %v1450_v35  ;;  %v1524_v42 = vadd.s32 1, %v2465_v18 }
 0x1bb   : > { %v2281_v45 = vmul.f32 1.442695, %v2258_v62  ;;  %v1470_v54 = vsel %vm1468_vm7, %v1469_v9, %v3914_v47  ;;  %v2243_v20 = vmul.f32 %v579_v63, %v579_v63  ;;  %v464_v49 = vmul.f32 %v2944_v27, %v3822_v50 }
 0x1bc   : > { %2321 = vst [vmem:[%s3365_s29 + $0x30] sm:$0xff] %v2305_v12  ;;  %vm1310_vm8 = vcmp.lt.s32.totalorder %v3698_v36, 0  ;;  %v1391_v0 = vmul.f32 %v1390_v30, %v1388_v33  ;;  %v1471_v7 = vadd.s32 %v1470_v54, %v1466_v23  ;;  %vm1525_vm9 = vcmp.gt.s32.totalorder %v1524_v42, 0 }
 0x1bd   : > { %v1395_v57 = vsel %vm1310_vm8, %v1394_v61, %v3840_v14  ;;  %v1514_v60 = vand.u32 2147483647, %v3885_v32  ;;  %v1526_v31 = vsel %vm1525_vm9, %v1524_v42, 0  ;;  %v541_v3 = vadd.f32 %v3035_v17, %v497_v28 }
 0x1be   : > { %v1392_v34 = vxor.u32 2147483648, %v1391_v0  ;;  %v1472_v19 = vadd.s32 536870912, %v1471_v7  ;;  %v1528_v38 = vand.u32 31, %v1526_v31  ;;  %vm3945_vm10 = vcmp.le.f32.partialorder %v1308_v59, 0.7853982 }
 0x1bf   : > { %2669 = vpow2.f32 %v2281_v45  ;;  %v2259_v50 = vsub.f32 0.0, %v2243_v20  ;;  %v496_v37 = vadd.f32 %v464_v49, %v4706_v4  ;;  %v1397_v14 = vsel %vm3945_vm10, 0, %v1395_v57 }
 0x1c0   : > { %v1393_v21 = vsel %vm1310_vm8, %v1392_v34, %v1391_v0  ;;  %v3952_v2 = vshrl.u32 %v1472_v19, 30  ;;  %v1529_v39 = vsub.s32 32, %v1528_v38  ;;  %v1521_v59 = vand.u32 8388607, %v1514_v60 }
 0x1c1   : > { %v1396_v15 = vsel %vm3945_vm10, %v3698_v36, %v1393_v21  ;;  %v3959_v47 = vshrl.u32 %v1526_v31, 5  ;;  %v3962_v6 = vmul.f32 %v3039_v26, %v541_v3  ;;  %v1531_v52 = vshll.u32 %v4677_v58, %v1528_v38 }
 0x1c2   : > { %2671 = vcosq.f32 %v1396_v15  ;;  %v1474_v48 = vshll.u32 %v3952_v2, 30  ;;  %v1534_v56 = vshll.u32 %v4678_v11, %v1528_v38  ;;  %v1532_v55 = vshrl.u32 %v4678_v11, %v1529_v39 }
 0x1c3   : > { %2673 = vsinq.f32 %v1396_v15  ;;  %v1535_v24 = vshrl.u32 %v4679_v13, %v1529_v39  ;;  %v1538_v62 = vshrl.u32 %v4680_v8, %v1529_v39  ;;  %v1537_v35 = vshll.u32 %v4679_v13, %v1528_v38 }
 0x1c4   : > { %v3970_v63 = vsub.s32 %v1471_v7, %v1474_v48  ;;  %v1540_v43 = vshll.u32 %v4680_v8, %v1528_v38  ;;  %v1541_v25 = vshrl.u32 %v4681_v1, %v1529_v39  ;;  %v3975_v18 = vand.u32 3, %v1397_v14 }
 0x1c5   : > { %v3978_v12 = vadd.f32 %v3065_v10, %v496_v37  ;;  %v1533_v61 = vor.u32 %v1532_v55, %v1531_v52  ;;  %v1536_v9 = vor.u32 %v1535_v24, %v1534_v56  ;;  %v1539_v28 = vor.u32 %v1538_v62, %v1537_v35 }
 0x1c6   : > { %v1477_v44 = vsub.s32 0, %v3970_v63  ;;  %v1542_v33 = vor.u32 %v1541_v25, %v1540_v43  ;;  %v1544_v30 = vshrl.u32 %v4682_v5, %v1529_v39  ;;  %v3982_v23 = vmul.f32 1.442695, %v2259_v50 }
 0x1c7   : > { %v1522_v42 = vor.u32 8388608, %v1521_v59  ;;  %v1543_v45 = vshll.u32 %v4681_v1, %v1528_v38  ;;  %v3987_v54 = vmul.f32 %v2944_v27, %v3902_v53  ;;  %v1530_v49 = vshrl.u32 %v4677_v58, %v1529_v39  ;;  %v4011_v39 = vpop.permute.xlu0 %408 }
 0x1c8   : > { %v2462_v20 = vmin.u32 %v1477_v44, %v3970_v63  ;;  %vm1546_vm11 = vcmp.lt.s32.totalorder %v3959_v47, 1  ;;  %v1620_v0 = vand.u32 2139095040, %v3962_v6  ;;  %vm1548_vm12 = vcmp.lt.s32.totalorder %v3959_v47, 3 }
 0x1c9   : > { %v1545_v7 = vor.u32 %v1544_v30, %v1543_v45  ;;  %vm1549_vm13 = vcmp.lt.s32.totalorder %v3959_v47, 4  ;;  %v1554_v57 = vsel %vm1546_vm11, %v1533_v61, %v1536_v9  ;;  %vm1403_vm14 = vcmp.eq.s32.totalorder %v3975_v18, 0 }
 0x1ca   : > { %v1479_v53 = vclz %v2462_v20  ;;  %v1551_v31 = vsel %vm1549_vm13, %v1539_v28, 2102212464  ;;  %v1555_v3 = vsel %vm1549_vm13, %v1542_v33, 920167782  ;;  %v1558_v34 = vsel %vm1546_vm11, %v1536_v9, %v1539_v28 }
 0x1cb   : > { %vm1402_vm15 = vcmp.lt.s32.totalorder %v3975_v18, 2  ;;  %vm1547_vm0 = vcmp.lt.s32.totalorder %v3959_v47, 2  ;;  %v1556_v19 = vsel %vm1548_vm12, %v1539_v28, %v1555_v3  ;;  %v1559_v38 = vsel %vm1549_vm13, %v1545_v7, 1326507024 }
 0x1cc   : > { %v1562_v41 = vshll.u32 %v1522_v42, 8  ;;  %v2670_v50 = vpop.eup %2669  ;;  %vm1400_vm1 = vweird.f32 %v3698_v36  ;;  %v2463_v4 = vadd.s32 4294967294, %v1479_v53  ;;  %v1550_v37 = vsel %vm1546_vm11, %v1530_v49, %v1533_v61 }
 0x1cd   : > { %v1557_v21 = vsel %vm1547_vm0, %v1554_v57, %v1556_v19  ;;  %v1560_v14 = vsel %vm1548_vm12, %v1542_v33, %v1559_v38  ;;  %v1552_v15 = vsel %vm1548_vm12, %v1536_v9, %v1551_v31  ;;  %v1621_v24 = vshrl.u32 %v1620_v0, 23 }
 0x1ce   : > { %v1561_v59 = vsel %vm1547_vm0, %v1558_v34, %v1560_v14  ;;  %v4017_v48 = vmul.u32.u64.low %v1562_v41, %v1557_v21  ;;  %v4018_v52 = vmul.u32.u64.high %v1562_v41, %v1557_v21, %v4017_v48  ;;  %vm2464_vm2 = vcmp.lt.s32.totalorder %v2463_v4, 0 }
 0x1cf   : > { %v4021_v56 = vmul.u32.u64.low %v1562_v41, %v1561_v59  ;;  %v4022_v55 = vmul.u32.u64.high %v1562_v41, %v1561_v59, %v4021_v56  ;;  %v2672_v62 = vpop.eup %2671  ;;  %vm1406_vm3 = vcmp.eq.s32.totalorder %v3975_v18, 2  ;;  %v1467_v35 = vadd.s32 %v3913_v22, %v3907_v51 }
 0x1d0   : > { %v1482_v43 = vsel %vm2464_vm2, 0, %v2463_v4  ;;  %v467_v25 = vmul.f32 %v3029_v16, %v4011_v39  ;;  %v2674_v61 = vpop.eup %2673  ;;  %v1407_v9 = vxor.u32 2147483648, %v2672_v62  ;;  %v1553_v33 = vsel %vm1547_vm0, %v1550_v37, %v1552_v15 }
 0x1d1   : > { %v1483_v44 = vsub.s32 32, %v1482_v43  ;;  %v1487_v28 = vsub.s32 4294967266, %v1482_v43  ;;  %v1404_v30 = vxor.u32 2147483648, %v2674_v61  ;;  %v1572_v42 = vadd.s32 1, %v4018_v52 }
 0x1d2   : > { %v1617_v45 = vand.u32 2147483647, %v3962_v6  ;;  %v2469_v20 = vadd.s32 4294967169, %v1621_v24  ;;  %v1408_v49 = vsel %vm1406_vm3, %v1407_v9, %v2674_v61  ;;  %v1484_v51 = vshll.u32 %v3970_v63, %v1482_v43 }
 0x1d3   : > { %v1485_v22 = vshrl.u32 %v1467_v35, %v1483_v44  ;;  %v1488_v0 = vadd.s32 127, %v1487_v28  ;;  %v1405_v7 = vsel %vm1403_vm14, %v2672_v62, %v1404_v30  ;;  %v1569_v57 = vmul.u32 %v1562_v41, %v1553_v33  ;;  %v4710_v62 = vld [vmem:[#allocation11_spill] sm:$0xff] }
 0x1d4   : > { %vm1571_vm4 = vc.u32 %v4022_v55, %v4017_v48  ;;  %v1627_v47 = vadd.s32 1, %v2469_v20  ;;  %v1409_v53 = vsel %vm1402_vm15, %v1405_v7, %v1408_v49  ;;  %v1497_v19 = vsub.s32 4, %v3952_v2 }
 0x1d5   : > { %v1486_v31 = vor.u32 %v1485_v22, %v1484_v51  ;;  %v1489_v3 = vshll.u32 %v1488_v0, 23  ;;  %v1573_v34 = vsel %vm1571_vm4, %v1572_v42, %v4018_v52  ;;  %v1410_v63 = vsel %vm1400_vm1, nan, %v1409_v53  ;;  %v4709_v52 = vld [vmem:[#allocation14_spill] sm:$0xff] }
 0x1d6   : > { %v1574_v38 = vadd.s32 %v1573_v34, %v1569_v57  ;;  %vm1628_vm5 = vcmp.gt.s32.totalorder %v1627_v47, 0  ;;  %v2306_v41 = vmul.f32 %v2670_v50, %v1410_v63  ;;  %v1624_v37 = vand.u32 8388607, %v1617_v45 }
 0x1d7   : > { %v1490_v4 = vor.u32 4788187, %v1489_v3  ;;  %v1629_v21 = vsel %vm1628_vm5, %v1627_v47, 0  ;;  %vm4048_vm6 = vcmp.le.f32.partialorder %v1411_v40, 0.7853982  ;;  %vm1413_vm7 = vcmp.lt.s32.totalorder %v3767_v46, 0 }
 0x1d8   : > { %v1575_v36 = vadd.s32 536870912, %v1574_v38  ;;  %v1631_v14 = vand.u32 31, %v1629_v21  ;;  %2322 = vst [vmem:[%s3365_s29 + $0x38] sm:$0xff] %v2306_v41  ;;  %v1493_v59 = vcvt.s32.f32 %v1486_v31  ;;  %v580_v50 = vmul.f32 %v3072_v29, %v3978_v12 }
 0x1d9   : > { %v1491_v15 = vand.u32 2147483647, %v1490_v4  ;;  %v498_v56 = vadd.f32 %v3987_v54, %v4709_v52  ;;  %2675 = vpow2.f32 %v3982_v23  ;;  %v499_v35 = vadd.f32 %v467_v25, %v4710_v62 }
 0x1da   : > { %v4059_v24 = vshrl.u32 %v1575_v36, 30  ;;  %v1632_v40 = vsub.s32 32, %v1631_v14  ;;  %v1498_v61 = vsel %vm1413_vm7, %v1497_v19, %v3952_v2  ;;  %v1625_v9 = vor.u32 8388608, %v1624_v37 }
 0x1db   : > { %v1494_v43 = vmul.f32 %v1493_v59, %v1491_v15  ;;  %v1630_v44 = vshrl.u32 %v1629_v21, 5  ;;  %v1634_v12 = vshll.u32 %v4677_v58, %v1631_v14  ;;  %v1637_v23 = vshll.u32 %v4678_v11, %v1631_v14 }
 0x1dc   : > { %v1577_v28 = vshll.u32 %v4059_v24, 30  ;;  %v1635_v54 = vshrl.u32 %v4678_v11, %v1632_v40  ;;  %v1638_v30 = vshrl.u32 %v4679_v13, %v1632_v40  ;;  %v1641_v25 = vshrl.u32 %v4680_v8, %v1632_v40 }
 0x1dd   : > { %v1495_v33 = vxor.u32 2147483648, %v1494_v43  ;;  %v1644_v42 = vshrl.u32 %v4681_v1, %v1632_v40  ;;  %v1640_v2 = vshll.u32 %v4679_v13, %v1631_v14  ;;  %v1643_v49 = vshll.u32 %v4680_v8, %v1631_v14 }
 0x1de   : > { %v4072_v20 = vsub.s32 %v1574_v38, %v1577_v28  ;;  %v1647_v51 = vshrl.u32 %v4682_v5, %v1632_v40  ;;  %v1636_v0 = vor.u32 %v1635_v54, %v1634_v12  ;;  %v1639_v7 = vor.u32 %v1638_v30, %v1637_v23 }
 0x1df   : > { %v1496_v22 = vsel %vm1413_vm7, %v1495_v33, %v1494_v43  ;;  %v1646_v57 = vshll.u32 %v4681_v1, %v1631_v14  ;;  %v1642_v31 = vor.u32 %v1641_v25, %v1640_v2  ;;  %v1645_v3 = vor.u32 %v1644_v42, %v1643_v49 }
 0x1e0   : > { %v1499_v47 = vsel %vm4048_vm6, %v3767_v46, %v1496_v22  ;;  %v1580_v53 = vsub.s32 0, %v4072_v20  ;;  %v1633_v34 = vshrl.u32 %v4677_v58, %v1632_v40  ;;  %v1665_v19 = vshll.u32 %v1625_v9, 8 }
 0x1e1   : > { %2677 = vcosq.f32 %v1499_v47  ;;  %v1648_v63 = vor.u32 %v1647_v51, %v1646_v57  ;;  %vm1649_vm8 = vcmp.lt.s32.totalorder %v1630_v44, 1  ;;  %v543_v41 = vadd.f32 %v3035_v17, %v499_v35 }
 0x1e2   : > { %2679 = vsinq.f32 %v1499_v47  ;;  %v2466_v38 = vmin.u32 %v1580_v53, %v4072_v20  ;;  %vm1650_vm9 = vcmp.lt.s32.totalorder %v1630_v44, 2  ;;  %vm1651_vm10 = vcmp.lt.s32.totalorder %v1630_v44, 3 }
 0x1e3   : > { %vm1652_vm11 = vcmp.lt.s32.totalorder %v1630_v44, 4  ;;  %v1653_v4 = vsel %vm1649_vm8, %v1633_v34, %v1636_v0  ;;  %v1657_v36 = vsel %vm1649_vm8, %v1636_v0, %v1639_v7  ;;  %v1661_v52 = vsel %vm1649_vm8, %v1639_v7, %v1642_v31  ;;  %v4106_v0 = vpop.permute.xlu1 %412 }
 0x1e4   : > { %v1582_v37 = vclz %v2466_v38  ;;  %v1654_v21 = vsel %vm1652_vm11, %v1642_v31, 2102212464  ;;  %v1658_v14 = vsel %vm1652_vm11, %v1645_v3, 920167782  ;;  %v1662_v40 = vsel %vm1652_vm11, %v1648_v63, 1326507024 }
 0x1e5   : > { %v1655_v15 = vsel %vm1651_vm10, %v1639_v7, %v1654_v21  ;;  %v1659_v59 = vsel %vm1651_vm10, %v1642_v31, %v1658_v14  ;;  %v2244_v43 = vmul.f32 %v580_v50, %v580_v50  ;;  %v1663_v28 = vsel %vm1651_vm10, %v1645_v3, %v1662_v40 }
 0x1e6   : > { %v2467_v62 = vadd.s32 4294967294, %v1582_v37  ;;  %v1660_v9 = vsel %vm1650_vm9, %v1657_v36, %v1659_v59  ;;  %v2676_v12 = vpop.eup %2675  ;;  %v1500_v35 = vsel %vm4048_vm6, 0, %v1498_v61  ;;  %v1664_v54 = vsel %vm1650_vm9, %v1661_v52, %v1663_v28 }
 0x1e7   : > { %v4091_v23 = vmul.u32.u64.low %v1665_v19, %v1660_v9  ;;  %v4092_v33 = vmul.u32.u64.high %v1665_v19, %v1660_v9, %v4091_v23  ;;  %v1656_v30 = vsel %vm1650_vm9, %v1653_v4, %v1655_v15  ;;  %vm1516_vm13 = vcmp.lt.s32.totalorder %v3885_v32, 0 }
 0x1e8   : > { %vm2468_vm12 = vcmp.lt.s32.totalorder %v2467_v62, 0  ;;  %v4096_v25 = vmul.u32.u64.low %v1665_v19, %v1664_v54  ;;  %v4097_v42 = vmul.u32.u64.high %v1665_v19, %v1664_v54, %v4096_v25  ;;  %v542_v2 = vadd.f32 %v3065_v10, %v498_v56 }
 0x1e9   : > { %v1585_v50 = vsel %vm2468_vm12, 0, %v2467_v62  ;;  %v4102_v18 = vmul.f32 %v3039_v26, %v543_v41  ;;  %v1504_v61 = vand.u32 3, %v1500_v35  ;;  %v1570_v49 = vadd.s32 %v4017_v48, %v4022_v55  ;;  %v4711_v62 = vld [vmem:[#allocation17_spill] sm:$0xff] }
 0x1ea   : > { %v1586_v51 = vsub.s32 32, %v1585_v50  ;;  %v1590_v22 = vsub.s32 4294967266, %v1585_v50  ;;  %vm1503_vm14 = vweird.f32 %v3767_v46  ;;  %v1600_v44 = vsub.s32 4, %v4059_v24 }
 0x1eb   : > { %v2260_v7 = vsub.f32 0.0, %v2244_v43  ;;  %v1672_v57 = vmul.u32 %v1665_v19, %v1656_v30  ;;  %v1675_v47 = vadd.s32 1, %v4092_v33  ;;  %v1587_v56 = vshll.u32 %v4072_v20, %v1585_v50 }
 0x1ec   : > { %v1588_v53 = vshrl.u32 %v1570_v49, %v1586_v51  ;;  %v1591_v31 = vadd.s32 127, %v1590_v22  ;;  %vm1674_vm15 = vc.u32 %v4097_v42, %v4091_v23  ;;  %v1720_v55 = vand.u32 2147483647, %v4102_v18 }
 0x1ed   : > { %v1676_v48 = vsel %vm1674_vm15, %v1675_v47, %v4092_v33  ;;  %v1723_v3 = vand.u32 2139095040, %v4102_v18  ;;  %v469_v34 = vmul.f32 %v3029_v16, %v4106_v0  ;;  %vm1505_vm0 = vcmp.lt.s32.totalorder %v1504_v61, 2 }
 0x1ee   : > { %v2678_v63 = vpop.eup %2677  ;;  %v1589_v19 = vor.u32 %v1588_v53, %v1587_v56  ;;  %v1592_v38 = vshll.u32 %v1591_v31, 23  ;;  %v1677_v41 = vadd.s32 %v1676_v48, %v1672_v57  ;;  %vm1506_vm1 = vcmp.eq.s32.totalorder %v1504_v61, 0 }
 0x1ef   : > { %v2680_v20 = vpop.eup %2679  ;;  %vm1509_vm2 = vcmp.eq.s32.totalorder %v1504_v61, 2  ;;  %v1510_v4 = vxor.u32 2147483648, %v2678_v63  ;;  %v1724_v37 = vshrl.u32 %v1723_v3, 23  ;;  %v1601_v14 = vsel %vm1516_vm13, %v1600_v44, %v4059_v24 }
 0x1f0   : > { %v1507_v21 = vxor.u32 2147483648, %v2680_v20  ;;  %v1593_v36 = vor.u32 4788187, %v1592_v38  ;;  %v1678_v15 = vadd.s32 536870912, %v1677_v41  ;;  %v1727_v40 = vand.u32 8388607, %v1720_v55 }
 0x1f1   : > { %v1511_v59 = vsel %vm1509_vm2, %v1510_v4, %v2680_v20  ;;  %v2473_v52 = vadd.s32 4294967169, %v1724_v37  ;;  %v501_v43 = vadd.f32 %v469_v34, %v4711_v62  ;;  %v1596_v35 = vcvt.s32.f32 %v1589_v19 }
 0x1f2   : > { %v1508_v9 = vsel %vm1506_vm1, %v2678_v63, %v1507_v21  ;;  %v1594_v28 = vand.u32 2147483647, %v1593_v36  ;;  %v4125_v54 = vshrl.u32 %v1678_v15, 30  ;;  %vm4130_vm3 = vcmp.le.f32.partialorder %v1514_v60, 0.7853982 }
 0x1f3   : > { %v1512_v33 = vsel %vm1505_vm0, %v1508_v9, %v1511_v59  ;;  %v2285_v30 = vmul.f32 1.442695, %v2260_v7  ;;  %v1730_v25 = vadd.s32 1, %v2473_v52  ;;  %v581_v51 = vmul.f32 %v3072_v29, %v542_v2 }
 0x1f4   : > { %v1513_v50 = vsel %vm1503_vm14, nan, %v1512_v33  ;;  %v1597_v49 = vmul.f32 %v1596_v35, %v1594_v28  ;;  %v1680_v22 = vshll.u32 %v4125_v54, 30  ;;  %v1603_v61 = vsel %vm4130_vm3, 0, %v1601_v14 }
 0x1f5   : > { %v2307_v44 = vmul.f32 %v2676_v12, %v1513_v50  ;;  %v1728_v57 = vor.u32 8388608, %v1727_v40  ;;  %vm1731_vm4 = vcmp.gt.s32.totalorder %v1730_v25, 0  ;;  %v545_v7 = vadd.f32 %v3035_v17, %v501_v43 }
 0x1f6   : > { %v1598_v60 = vxor.u32 2147483648, %v1597_v49  ;;  %v4140_v47 = vsub.s32 %v1677_v41, %v1680_v22  ;;  %v1732_v56 = vsel %vm1731_vm4, %v1730_v25, 0  ;;  %2681 = vpow2.f32 %v2285_v30 }
 0x1f7   : > { %2323 = vst [vmem:[%s3365_s29 + $0x40] sm:$0xff] %v2307_v44  ;;  %v4146_v46 = vmul.f32 %v2944_v27, %v4011_v39  ;;  %v1734_v2 = vand.u32 31, %v1732_v56  ;;  %v4150_v53 = vand.u32 3, %v1603_v61  ;;  %v4153_v48 = vmul.f32 %v581_v51, %v581_v51 }
 0x1f8   : > { %v1599_v12 = vsel %vm1516_vm13, %v1598_v60, %v1597_v49  ;;  %v1683_v31 = vsub.s32 0, %v4140_v47  ;;  %v1673_v34 = vadd.s32 %v4091_v23, %v4097_v42  ;;  %v4160_v39 = vshll.u32 %v1728_v57, 8 }
 0x1f9   : > { %v1602_v3 = vsel %vm4130_vm3, %v3885_v32, %v1599_v12  ;;  %v1735_v63 = vsub.s32 32, %v1734_v2  ;;  %v1733_v38 = vshrl.u32 %v1732_v56, 5  ;;  %v4164_v41 = vmul.f32 %v3039_v26, %v545_v7 }
 0x1fa   : > { %2683 = vcosq.f32 %v1602_v3  ;;  %v2470_v19 = vmin.u32 %v1683_v31, %v4140_v47  ;;  %v1737_v20 = vshll.u32 %v4677_v58, %v1734_v2  ;;  %v1740_v37 = vshll.u32 %v4678_v11, %v1734_v2 }
 0x1fb   : > { %2685 = vsinq.f32 %v1602_v3  ;;  %v1738_v4 = vshrl.u32 %v4678_v11, %v1735_v63  ;;  %v1741_v23 = vshrl.u32 %v4679_v13, %v1735_v63  ;;  %v1743_v42 = vshll.u32 %v4679_v13, %v1734_v2 }
 0x1fc   : > { %v1685_v21 = vclz %v2470_v19  ;;  %v1744_v36 = vshrl.u32 %v4680_v8, %v1735_v63  ;;  %v1746_v15 = vshll.u32 %v4680_v8, %v1734_v2  ;;  %v1747_v59 = vshrl.u32 %v4681_v1, %v1735_v63 }
 0x1fd   : > { %v1739_v14 = vor.u32 %v1738_v4, %v1737_v20  ;;  %v1749_v52 = vshll.u32 %v4681_v1, %v1734_v2  ;;  %v1742_v62 = vor.u32 %v1741_v23, %v1740_v37  ;;  %v1750_v9 = vshrl.u32 %v4682_v5, %v1735_v63 }
 0x1fe   : > { %v2471_v40 = vadd.s32 4294967294, %v1685_v21  ;;  %v1745_v43 = vor.u32 %v1744_v36, %v1743_v42  ;;  %v1736_v28 = vshrl.u32 %v4677_v58, %v1735_v63  ;;  %v1748_v35 = vor.u32 %v1747_v59, %v1746_v15 }
 0x1ff   : > { %vm1752_vm5 = vcmp.lt.s32.totalorder %v1733_v38, 1  ;;  %vm1753_vm6 = vcmp.lt.s32.totalorder %v1733_v38, 2  ;;  %v1751_v33 = vor.u32 %v1750_v9, %v1749_v52  ;;  %vm1754_vm8 = vcmp.lt.s32.totalorder %v1733_v38, 3 }
 0x200   : > { %vm2472_vm7 = vcmp.lt.s32.totalorder %v2471_v40, 0  ;;  %vm1755_vm9 = vcmp.lt.s32.totalorder %v1733_v38, 4  ;;  %v1760_v25 = vsel %vm1752_vm5, %v1739_v14, %v1742_v62  ;;  %v1756_v22 = vsel %vm1752_vm5, %v1736_v28, %v1739_v14 }
 0x201   : > { %v1688_v24 = vsel %vm2472_vm7, 0, %v2471_v40  ;;  %v1757_v30 = vsel %vm1755_vm9, %v1745_v43, 2102212464  ;;  %v1761_v50 = vsel %vm1755_vm9, %v1748_v35, 920167782  ;;  %vm1619_vm10 = vcmp.lt.s32.totalorder %v3962_v6, 0 }
 0x202   : > { %v1689_v49 = vsub.s32 32, %v1688_v24  ;;  %v1693_v51 = vsub.s32 4294967266, %v1688_v24  ;;  %v1758_v44 = vsel %vm1754_vm8, %v1742_v62, %v1757_v30  ;;  %v1690_v61 = vshll.u32 %v4140_v47, %v1688_v24 }
 0x203   : > { %v1762_v57 = vsel %vm1754_vm8, %v1745_v43, %v1761_v50  ;;  %v1764_v60 = vsel %vm1752_vm5, %v1742_v62, %v1745_v43  ;;  %v1765_v56 = vsel %vm1755_vm9, %v1751_v33, 1326507024  ;;  %v2682_v7 = vpop.eup %2681  ;;  %vm1606_vm11 = vweird.f32 %v3885_v32 }
 0x204   : > { %v1691_v2 = vshrl.u32 %v1673_v34, %v1689_v49  ;;  %v1694_v12 = vadd.s32 127, %v1693_v51  ;;  %v1763_v31 = vsel %vm1753_vm6, %v1760_v25, %v1762_v57  ;;  %v1766_v3 = vsel %vm1754_vm8, %v1748_v35, %v1765_v56  ;;  %v4716_v56 = vld [vmem:[#allocation12_spill] sm:$0xff] }
 0x205   : > { %v1759_v63 = vsel %vm1753_vm6, %v1756_v22, %v1758_v44  ;;  %v1767_v19 = vsel %vm1753_vm6, %v1764_v60, %v1766_v3  ;;  %v4190_v47 = vmul.u32.u64.low %v4160_v39, %v1763_v31  ;;  %v4191_v20 = vmul.u32.u64.high %v4160_v39, %v1763_v31, %v4190_v47 }
 0x206   : > { %v1692_v4 = vor.u32 %v1691_v2, %v1690_v61  ;;  %v1695_v37 = vshll.u32 %v1694_v12, 23  ;;  %v4195_v21 = vmul.u32.u64.low %v4160_v39, %v1767_v19  ;;  %v4196_v23 = vmul.u32.u64.high %v4160_v39, %v1767_v19, %v4195_v21 }
 0x207   : > { %v2684_v34 = vpop.eup %2683  ;;  %vm1608_vm12 = vcmp.lt.s32.totalorder %v4150_v53, 2  ;;  %vm1609_vm13 = vcmp.eq.s32.totalorder %v4150_v53, 0  ;;  %v2261_v42 = vsub.f32 0.0, %v4153_v48  ;;  %v1826_v38 = vand.u32 2139095040, %v4164_v41 }
 0x208   : > { %v2686_v36 = vpop.eup %2685  ;;  %vm1612_vm14 = vcmp.eq.s32.totalorder %v4150_v53, 2  ;;  %v1613_v14 = vxor.u32 2147483648, %v2684_v34  ;;  %v1696_v15 = vor.u32 4788187, %v1695_v37  ;;  %v1703_v59 = vsub.s32 4, %v4125_v54  ;;  %v4225_v53 = vpop.permute.xlu0 %416 }
 0x209   : > { %v1610_v52 = vxor.u32 2147483648, %v2686_v36  ;;  %v1775_v40 = vmul.u32 %v4160_v39, %v1759_v63  ;;  %v1778_v62 = vadd.s32 1, %v4191_v20  ;;  %v1827_v43 = vshrl.u32 %v1826_v38, 23 }
 0x20a   : > { %v1614_v9 = vsel %vm1612_vm14, %v1613_v14, %v2686_v36  ;;  %v1697_v28 = vand.u32 2147483647, %v1696_v15  ;;  %v1699_v35 = vcvt.s32.f32 %v1692_v4  ;;  %vm1777_vm15 = vc.u32 %v4196_v23, %v4190_v47  ;;  %v4717_v14 = vld [vmem:[#allocation15_spill] sm:$0xff] }
 0x20b   : > { %v1611_v48 = vsel %vm1609_vm13, %v2684_v34, %v1610_v52  ;;  %v1779_v33 = vsel %vm1777_vm15, %v1778_v62, %v4191_v20  ;;  %v1823_v24 = vand.u32 2147483647, %v4164_v41  ;;  %v2477_v30 = vadd.s32 4294967169, %v1827_v43 }
 0x20c   : > { %v1615_v39 = vsel %vm1608_vm12, %v1611_v48, %v1614_v9  ;;  %v1700_v25 = vmul.f32 %v1699_v35, %v1697_v28  ;;  %v1704_v50 = vsel %vm1619_vm10, %v1703_v59, %v4125_v54  ;;  %v1780_v49 = vadd.s32 %v1779_v33, %v1775_v40 }
 0x20d   : > { %v1616_v51 = vsel %vm1606_vm11, nan, %v1615_v39  ;;  %vm4221_vm0 = vcmp.le.f32.partialorder %v1617_v45, 0.7853982  ;;  %v2287_v44 = vmul.f32 1.442695, %v2261_v42  ;;  %v1833_v61 = vadd.s32 1, %v2477_v30 }
 0x20e   : > { %v2308_v57 = vmul.f32 %v2682_v7, %v1616_v51  ;;  %v1701_v60 = vxor.u32 2147483648, %v1700_v25  ;;  %v500_v2 = vadd.f32 %v4146_v46, %v4716_v56  ;;  %v1781_v54 = vadd.s32 536870912, %v1780_v49 }
 0x20f   : > { %v1706_v32 = vsel %vm4221_vm0, 0, %v1704_v50  ;;  %v1830_v12 = vand.u32 8388607, %v1823_v24  ;;  %vm1834_vm1 = vcmp.gt.s32.totalorder %v1833_v61, 0  ;;  %v471_v7 = vmul.f32 %v3029_v16, %v4225_v53  ;;  %v4718_v50 = vld [vmem:[#allocation18_spill] sm:$0xff] }
 0x210   : > { %2324 = vst [vmem:[%s3365_s29 + $0x48] sm:$0xff] %v2308_v57  ;;  %v1702_v45 = vsel %vm1619_vm10, %v1701_v60, %v1700_v25  ;;  %v4236_v31 = vshrl.u32 %v1781_v54, 30  ;;  %v1835_v3 = vsel %vm1834_vm1, %v1833_v61, 0  ;;  %2687 = vpow2.f32 %v2287_v44 }
 0x211   : > { %v1705_v46 = vsel %vm4221_vm0, %v3962_v6, %v1702_v45  ;;  %v1837_v63 = vand.u32 31, %v1835_v3  ;;  %v544_v19 = vadd.f32 %v3065_v10, %v500_v2  ;;  %v470_v4 = vmul.f32 %v2944_v27, %v4106_v0 }
 0x212   : > { %2689 = vcosq.f32 %v1705_v46  ;;  %v1783_v20 = vshll.u32 %v4236_v31, 30  ;;  %v4247_v37 = vand.u32 3, %v1706_v32  ;;  %v1831_v21 = vor.u32 8388608, %v1830_v12 }
 0x213   : > { %2691 = vsinq.f32 %v1705_v46  ;;  %v1838_v34 = vsub.s32 32, %v1837_v63  ;;  %v1836_v38 = vshrl.u32 %v1835_v3, 5  ;;  %v1840_v36 = vshll.u32 %v4677_v58, %v1837_v63 }
 0x214   : > { %v4249_v42 = vsub.s32 %v1780_v49, %v1783_v20  ;;  %v503_v15 = vadd.f32 %v471_v7, %v4717_v14  ;;  %v1843_v52 = vshll.u32 %v4678_v11, %v1837_v63  ;;  %v1846_v0 = vshll.u32 %v4679_v13, %v1837_v63 }
 0x215   : > { %v1841_v59 = vshrl.u32 %v4678_v11, %v1838_v34  ;;  %v1844_v40 = vshrl.u32 %v4679_v13, %v1838_v34  ;;  %v1847_v43 = vshrl.u32 %v4680_v8, %v1838_v34  ;;  %v1849_v9 = vshll.u32 %v4680_v8, %v1837_v63 }
 0x216   : > { %v1786_v62 = vsub.s32 0, %v4249_v42  ;;  %v1850_v28 = vshrl.u32 %v4681_v1, %v1838_v34  ;;  %v1852_v33 = vshll.u32 %v4681_v1, %v1837_v63  ;;  %v1853_v30 = vshrl.u32 %v4682_v5, %v1838_v34 }
 0x217   : > { %v1842_v35 = vor.u32 %v1841_v59, %v1840_v36  ;;  %v1845_v48 = vor.u32 %v1844_v40, %v1843_v52  ;;  %v582_v39 = vmul.f32 %v3072_v29, %v544_v19  ;;  %v502_v49 = vadd.f32 %v470_v4, %v4718_v50 }
 0x218   : > { %v2474_v25 = vmin.u32 %v1786_v62, %v4249_v42  ;;  %v4266_v51 = vshll.u32 %v1831_v21, 8  ;;  %vm1715_vm2 = vcmp.eq.s32.totalorder %v4247_v37, 2  ;;  %v1848_v22 = vor.u32 %v1847_v43, %v1846_v0 }
 0x219   : > { %v1851_v44 = vor.u32 %v1850_v28, %v1849_v9  ;;  %v1854_v61 = vor.u32 %v1853_v30, %v1852_v33  ;;  %v547_v57 = vadd.f32 %v3035_v17, %v503_v15  ;;  %vm1712_vm3 = vcmp.eq.s32.totalorder %v4247_v37, 0 }
 0x21a   : > { %v1788_v60 = vclz %v2474_v25  ;;  %v1839_v56 = vshrl.u32 %v4677_v58, %v1838_v34  ;;  %vm1855_vm4 = vcmp.lt.s32.totalorder %v1836_v38, 1  ;;  %vm1858_vm5 = vcmp.lt.s32.totalorder %v1836_v38, 4 }
 0x21b   : > { %vm1857_vm6 = vcmp.lt.s32.totalorder %v1836_v38, 3  ;;  %v1860_v2 = vsel %vm1858_vm5, %v1848_v22, 2102212464  ;;  %v1863_v54 = vsel %vm1855_vm4, %v1842_v35, %v1845_v48  ;;  %v1864_v32 = vsel %vm1858_vm5, %v1851_v44, 920167782 }
 0x21c   : > { %vm1709_vm7 = vweird.f32 %v3962_v6  ;;  %v2475_v12 = vadd.s32 4294967294, %v1788_v60  ;;  %vm1856_vm8 = vcmp.lt.s32.totalorder %v1836_v38, 2  ;;  %v1865_v45 = vsel %vm1857_vm6, %v1848_v22, %v1864_v32 }
 0x21d   : > { %v1867_v3 = vsel %vm1855_vm4, %v1845_v48, %v1848_v22  ;;  %v1859_v7 = vsel %vm1855_vm4, %v1839_v56, %v1842_v35  ;;  %v1861_v46 = vsel %vm1857_vm6, %v1845_v48, %v1860_v2  ;;  %v1866_v63 = vsel %vm1856_vm8, %v1863_v54, %v1865_v45  ;;  %v2688_v20 = vpop.eup %2687 }
 0x21e   : > { %v1868_v19 = vsel %vm1858_vm5, %v1854_v61, 1326507024  ;;  %vm2476_vm9 = vcmp.lt.s32.totalorder %v2475_v12, 0  ;;  %v4275_v21 = vmul.u32.u64.low %v4266_v51, %v1866_v63  ;;  %v4276_v34 = vmul.u32.u64.high %v4266_v51, %v1866_v63, %v4275_v21 }
 0x21f   : > { %v1869_v4 = vsel %vm1857_vm6, %v1851_v44, %v1868_v19  ;;  %v2690_v36 = vpop.eup %2689  ;;  %v1776_v14 = vadd.s32 %v4190_v47, %v4196_v23  ;;  %v1791_v15 = vsel %vm2476_vm9, 0, %v2475_v12  ;;  %v4283_v52 = vmul.f32 %v3039_v26, %v547_v57 }
 0x220   : > { %v1870_v59 = vsel %vm1856_vm8, %v1867_v3, %v1869_v4  ;;  %v2692_v40 = vpop.eup %2691  ;;  %v1716_v0 = vxor.u32 2147483648, %v2690_v36  ;;  %v1792_v62 = vsub.s32 32, %v1791_v15  ;;  %v1796_v43 = vsub.s32 4294967266, %v1791_v15  ;;  %v4306_v3 = vpop.permute.xlu1 %420 }
 0x221   : > { %v1862_v9 = vsel %vm1856_vm8, %v1859_v7, %v1861_v46  ;;  %v1713_v28 = vxor.u32 2147483648, %v2692_v40  ;;  %v1793_v35 = vshll.u32 %v4249_v42, %v1791_v15  ;;  %v1881_v25 = vadd.s32 1, %v4276_v34 }
 0x222   : > { %v4288_v48 = vmul.u32.u64.low %v4266_v51, %v1870_v59  ;;  %v4289_v33 = vmul.u32.u64.high %v4266_v51, %v1870_v59, %v4288_v48  ;;  %v1717_v47 = vsel %vm1715_vm2, %v1716_v0, %v2692_v40  ;;  %v1794_v23 = vshrl.u32 %v1776_v14, %v1792_v62 }
 0x223   : > { %v1797_v30 = vadd.s32 127, %v1796_v43  ;;  %vm1711_vm10 = vcmp.lt.s32.totalorder %v4247_v37, 2  ;;  %v1714_v38 = vsel %vm1712_vm3, %v2690_v36, %v1713_v28  ;;  %v2246_v50 = vmul.f32 %v582_v39, %v582_v39 }
 0x224   : > { %v1929_v22 = vand.u32 2139095040, %v4283_v52  ;;  %v1718_v42 = vsel %vm1711_vm10, %v1714_v38, %v1717_v47  ;;  %v1795_v44 = vor.u32 %v1794_v23, %v1793_v35  ;;  %v546_v57 = vadd.f32 %v3065_v10, %v502_v49 }
 0x225   : > { %v1798_v61 = vshll.u32 %v1797_v30, 23  ;;  %v1719_v60 = vsel %vm1709_vm7, nan, %v1718_v42  ;;  %v1878_v56 = vmul.u32 %v4266_v51, %v1862_v9  ;;  %vm1880_vm11 = vc.u32 %v4289_v33, %v4275_v21  ;;  %v4721_v9 = vld [vmem:[#allocation21_spill] sm:$0xff] }
 0x226   : > { %v2309_v2 = vmul.f32 %v2688_v20, %v1719_v60  ;;  %v1806_v39 = vsub.s32 4, %v4236_v31  ;;  %v1882_v54 = vsel %vm1880_vm11, %v1881_v25, %v4276_v34  ;;  %v2262_v32 = vsub.f32 0.0, %v2246_v50 }
 0x227   : > { %v1799_v37 = vor.u32 4788187, %v1798_v61  ;;  %v1883_v12 = vadd.s32 %v1882_v54, %v1878_v56  ;;  %v1930_v45 = vshrl.u32 %v1929_v22, 23  ;;  %v1802_v6 = vcvt.s32.f32 %v1795_v44 }
 0x228   : > { %2325 = vst [vmem:[%s3365_s29 + $0x50] sm:$0xff] %v2309_v2  ;;  %v583_v7 = vmul.f32 %v3072_v29, %v546_v57  ;;  %vm1722_vm12 = vcmp.lt.s32.totalorder %v4102_v18, 0  ;;  %v473_v20 = vmul.f32 %v3029_v16, %v4306_v3  ;;  %v2289_v4 = vmul.f32 1.442695, %v2262_v32 }
 0x229   : > { %v1800_v49 = vand.u32 2147483647, %v1799_v37  ;;  %v1884_v51 = vadd.s32 536870912, %v1883_v12  ;;  %v2481_v46 = vadd.s32 4294967169, %v1930_v45  ;;  %v1807_v19 = vsel %vm1722_vm12, %v1806_v39, %v4236_v31 }
 0x22a   : > { %vm4318_vm13 = vcmp.le.f32.partialorder %v1720_v55, 0.7853982  ;;  %v4322_v59 = vmul.f32 %v583_v7, %v583_v7  ;;  %v1926_v62 = vand.u32 2147483647, %v4283_v52  ;;  %v505_v28 = vadd.f32 %v473_v20, %v4721_v9 }
 0x22b   : > { %v1803_v63 = vmul.f32 %v1802_v6, %v1800_v49  ;;  %v4314_v34 = vshrl.u32 %v1884_v51, 30  ;;  %v1936_v36 = vadd.s32 1, %v2481_v46  ;;  %v1809_v40 = vsel %vm4318_vm13, 0, %v1807_v19 }
 0x22c   : > { %2693 = vpow2.f32 %v2289_v4  ;;  %v2263_v48 = vsub.f32 0.0, %v4322_v59  ;;  %v4335_v23 = vand.u32 3, %v1809_v40  ;;  %v4340_v25 = vmul.f32 %v2944_v27, %v4225_v53 }
 0x22d   : > { %v1804_v15 = vxor.u32 2147483648, %v1803_v63  ;;  %v1886_v31 = vshll.u32 %v4314_v34, 30  ;;  %vm1937_vm14 = vcmp.gt.s32.totalorder %v1936_v36, 0  ;;  %v1879_v38 = vadd.s32 %v4275_v21, %v4289_v33 }
 0x22e   : > { %v1938_v43 = vsel %vm1937_vm14, %v1936_v36, 0  ;;  %v1933_v50 = vand.u32 8388607, %v1926_v62  ;;  %v549_v42 = vadd.f32 %v3035_v17, %v505_v28  ;;  %vm1818_vm15 = vcmp.eq.s32.totalorder %v4335_v23, 2 }
 0x22f   : > { %v1805_v0 = vsel %vm1722_vm12, %v1804_v15, %v1803_v63  ;;  %v4332_v35 = vsub.s32 %v1883_v12, %v1886_v31  ;;  %v1940_v47 = vand.u32 31, %v1938_v43  ;;  %v4348_v61 = vshrl.u32 %v1938_v43, 5 }
 0x230   : > { %v1808_v55 = vsel %vm4318_vm13, %v4102_v18, %v1805_v0  ;;  %v1934_v7 = vor.u32 8388608, %v1933_v50  ;;  %v4362_v46 = vmul.f32 %v3039_v26, %v549_v42  ;;  %vm1815_vm0 = vcmp.eq.s32.totalorder %v4335_v23, 0 }
 0x231   : > { %2695 = vcosq.f32 %v1808_v55  ;;  %v1889_v30 = vsub.s32 0, %v4332_v35  ;;  %v1941_v22 = vsub.s32 32, %v1940_v47  ;;  %v1943_v57 = vshll.u32 %v4677_v58, %v1940_v47 }
 0x232   : > { %2697 = vsinq.f32 %v1808_v55  ;;  %v1946_v60 = vshll.u32 %v4678_v11, %v1940_v47  ;;  %v1949_v21 = vshll.u32 %v4679_v13, %v1940_v47  ;;  %v1952_v37 = vshll.u32 %v4680_v8, %v1940_v47 }
 0x233   : > { %v2478_v44 = vmin.u32 %v1889_v30, %v4332_v35  ;;  %v1944_v53 = vshrl.u32 %v4678_v11, %v1941_v22  ;;  %v1947_v56 = vshrl.u32 %v4679_v13, %v1941_v22  ;;  %v1950_v33 = vshrl.u32 %v4680_v8, %v1941_v22 }
 0x234   : > { %v1953_v39 = vshrl.u32 %v4681_v1, %v1941_v22  ;;  %v1955_v54 = vshll.u32 %v4681_v1, %v1940_v47  ;;  %v1956_v49 = vshrl.u32 %v4682_v5, %v1941_v22  ;;  %v1942_v63 = vshrl.u32 %v4677_v58, %v1941_v22 }
 0x235   : > { %v1891_v2 = vclz %v2478_v44  ;;  %v1945_v32 = vor.u32 %v1944_v53, %v1943_v57  ;;  %v1948_v12 = vor.u32 %v1947_v56, %v1946_v60  ;;  %v1951_v45 = vor.u32 %v1950_v33, %v1949_v21 }
 0x236   : > { %v1954_v51 = vor.u32 %v1953_v39, %v1952_v37  ;;  %v1957_v19 = vor.u32 %v1956_v49, %v1955_v54  ;;  %vm1958_vm1 = vcmp.lt.s32.totalorder %v4348_v61, 1  ;;  %vm1961_vm2 = vcmp.lt.s32.totalorder %v4348_v61, 4 }
 0x237   : > { %v2479_v6 = vadd.s32 4294967294, %v1891_v2  ;;  %vm1960_vm4 = vcmp.lt.s32.totalorder %v4348_v61, 3  ;;  %v1966_v20 = vsel %vm1958_vm1, %v1945_v32, %v1948_v12  ;;  %vm1812_vm5 = vweird.f32 %v4102_v18 }
 0x238   : > { %v1967_v4 = vsel %vm1961_vm2, %v1954_v51, 920167782  ;;  %v1970_v15 = vsel %vm1958_vm1, %v1948_v12, %v1951_v45  ;;  %v1971_v40 = vsel %vm1961_vm2, %v1957_v19, 1326507024  ;;  %vm1959_vm6 = vcmp.lt.s32.totalorder %v4348_v61, 2 }
 0x239   : > { %vm2480_vm3 = vcmp.lt.s32.totalorder %v2479_v6, 0  ;;  %v1968_v14 = vsel %vm1960_vm4, %v1951_v45, %v1967_v4  ;;  %v1974_v43 = vshll.u32 %v1934_v7, 8  ;;  %v2694_v9 = vpop.eup %2693  ;;  %v1962_v55 = vsel %vm1958_vm1, %v1942_v63, %v1945_v32 }
 0x23a   : > { %v1894_v36 = vsel %vm2480_vm3, 0, %v2479_v6  ;;  %v1963_v47 = vsel %vm1961_vm2, %v1951_v45, 2102212464  ;;  %v1972_v30 = vsel %vm1960_vm4, %v1954_v51, %v1971_v40  ;;  %v1969_v44 = vsel %vm1959_vm6, %v1966_v20, %v1968_v14  ;;  %v4411_v20 = vpop.permute.xlu0 %424 }
 0x23b   : > { %v1895_v31 = vsub.s32 32, %v1894_v36  ;;  %v1899_v0 = vsub.s32 4294967266, %v1894_v36  ;;  %v1896_v28 = vshll.u32 %v4332_v35, %v1894_v36  ;;  %v1973_v57 = vsel %vm1959_vm6, %v1970_v15, %v1972_v30  ;;  %v4722_v15 = vld [vmem:[#allocation16_spill] sm:$0xff] }
 0x23c   : > { %v4392_v53 = vmul.u32.u64.low %v1974_v43, %v1973_v57  ;;  %v4393_v56 = vmul.u32.u64.high %v1974_v43, %v1973_v57, %v4392_v53  ;;  %v2032_v21 = vand.u32 2139095040, %v4362_v46  ;;  %vm1814_vm7 = vcmp.lt.s32.totalorder %v4335_v23, 2 }
 0x23d   : > { %v1897_v22 = vshrl.u32 %v1879_v38, %v1895_v31  ;;  %v1900_v42 = vadd.s32 127, %v1899_v0  ;;  %v1964_v38 = vsel %vm1960_vm4, %v1948_v12, %v1963_v47  ;;  %v1909_v7 = vsub.s32 4, %v4314_v34 }
 0x23e   : > { %v2696_v50 = vpop.eup %2695  ;;  %v4400_v54 = vmul.u32.u64.low %v1974_v43, %v1969_v44  ;;  %v4401_v32 = vmul.u32.u64.high %v1974_v43, %v1969_v44, %v4400_v54  ;;  %v2033_v45 = vshrl.u32 %v2032_v21, 23  ;;  %v1965_v12 = vsel %vm1959_vm6, %v1962_v55, %v1964_v38 }
 0x23f   : > { %v2698_v60 = vpop.eup %2697  ;;  %v1819_v35 = vxor.u32 2147483648, %v2696_v50  ;;  %v1898_v2 = vor.u32 %v1897_v22, %v1896_v28  ;;  %v1901_v37 = vshll.u32 %v1900_v42, 23  ;;  %v2029_v63 = vand.u32 2147483647, %v4362_v46 }
 0x240   : > { %v1816_v33 = vxor.u32 2147483648, %v2698_v60  ;;  %v2485_v19 = vadd.s32 4294967169, %v2033_v45  ;;  %vm1983_vm8 = vc.u32 %v4393_v56, %v4400_v54  ;;  %v504_v40 = vadd.f32 %v4340_v25, %v4722_v15 }
 0x241   : > { %v1820_v39 = vsel %vm1818_vm15, %v1819_v35, %v2698_v60  ;;  %v1902_v6 = vor.u32 4788187, %v1901_v37  ;;  %v1905_v14 = vcvt.s32.f32 %v1898_v2  ;;  %v1984_v61 = vadd.s32 1, %v4401_v32  ;;  %v4725_v60 = vld [vmem:[#allocation19_spill] sm:$0xff] }
 0x242   : > { %v1817_v49 = vsel %vm1815_vm0, %v2696_v50, %v1816_v33  ;;  %v2039_v31 = vadd.s32 1, %v2485_v19  ;;  %vm1825_vm9 = vcmp.lt.s32.totalorder %v4164_v41, 0  ;;  %v1981_v28 = vmul.u32 %v1974_v43, %v1965_v12 }
 0x243   : > { %v1821_v51 = vsel %vm1814_vm7, %v1817_v49, %v1820_v39  ;;  %v1903_v36 = vand.u32 2147483647, %v1902_v6  ;;  %v475_v18 = vmul.f32 %v3029_v16, %v4411_v20  ;;  %v1910_v55 = vsel %vm1825_vm9, %v1909_v7, %v4314_v34 }
 0x244   : > { %v1822_v4 = vsel %vm1812_vm5, nan, %v1821_v51  ;;  %v2036_v25 = vand.u32 8388607, %v2029_v63  ;;  %vm2040_vm10 = vcmp.gt.s32.totalorder %v2039_v31, 0  ;;  %vm4432_vm11 = vcmp.le.f32.partialorder %v1823_v24, 0.7853982 }
 0x245   : > { %v2310_v23 = vmul.f32 %v2694_v9, %v1822_v4  ;;  %v1906_v0 = vmul.f32 %v1905_v14, %v1903_v36  ;;  %v1985_v9 = vsel %vm1983_vm8, %v1984_v61, %v4401_v32  ;;  %v2041_v50 = vsel %vm2040_vm10, %v2039_v31, 0 }
 0x246   : > { %v1986_v30 = vadd.s32 %v1985_v9, %v1981_v28  ;;  %v2291_v16 = vmul.f32 1.442695, %v2263_v48  ;;  %v548_v34 = vadd.f32 %v3065_v10, %v504_v40  ;;  %v2043_v22 = vand.u32 31, %v2041_v50 }
 0x247   : > { %2326 = vst [vmem:[%s3365_s29 + $0x58] sm:$0xff] %v2310_v23  ;;  %v1907_v47 = vxor.u32 2147483648, %v1906_v0  ;;  %v1912_v44 = vsel %vm4432_vm11, 0, %v1910_v55  ;;  %v507_v35 = vadd.f32 %v475_v18, %v4725_v60  ;;  %v2037_v53 = vor.u32 8388608, %v2036_v25 }
 0x248   : > { %v1987_v57 = vadd.s32 536870912, %v1986_v30  ;;  %v2042_v21 = vshrl.u32 %v2041_v50, 5  ;;  %v2044_v59 = vsub.s32 32, %v2043_v22  ;;  %v2046_v33 = vshll.u32 %v4677_v58, %v2043_v22 }
 0x249   : > { %v1908_v42 = vsel %vm1825_vm9, %v1907_v47, %v1906_v0  ;;  %v2049_v2 = vshll.u32 %v4678_v11, %v2043_v22  ;;  %v2052_v39 = vshll.u32 %v4679_v13, %v2043_v22  ;;  %v2055_v49 = vshll.u32 %v4680_v8, %v2043_v22 }
 0x24a   : > { %v1911_v24 = vsel %vm4432_vm11, %v4164_v41, %v1908_v42  ;;  %v4447_v48 = vshrl.u32 %v1987_v57, 30  ;;  %v2047_v37 = vshrl.u32 %v4678_v11, %v2044_v59  ;;  %v2050_v38 = vshrl.u32 %v4679_v13, %v2044_v59 }
 0x24b   : > { %2699 = vcosq.f32 %v1911_v24  ;;  %v2053_v45 = vshrl.u32 %v4680_v8, %v2044_v59  ;;  %v2056_v6 = vshrl.u32 %v4681_v1, %v2044_v59  ;;  %v2058_v12 = vshll.u32 %v4681_v1, %v2043_v22 }
 0x24c   : > { %2701 = vsinq.f32 %v1911_v24  ;;  %v1989_v32 = vshll.u32 %v4447_v48, 30  ;;  %v2048_v7 = vor.u32 %v2047_v37, %v2046_v33  ;;  %v2051_v51 = vor.u32 %v2050_v38, %v2049_v2 }
 0x24d   : > { %v2059_v19 = vshrl.u32 %v4682_v5, %v2044_v59  ;;  %v2054_v36 = vor.u32 %v2053_v45, %v2052_v39  ;;  %v2057_v14 = vor.u32 %v2056_v6, %v2055_v49  ;;  %v551_v23 = vadd.f32 %v3035_v17, %v507_v35 }
 0x24e   : > { %v4460_v4 = vsub.s32 %v1986_v30, %v1989_v32  ;;  %v1916_v15 = vand.u32 3, %v1912_v44  ;;  %2703 = vpow2.f32 %v2291_v16  ;;  %v584_v40 = vmul.f32 %v3072_v29, %v548_v34 }
 0x24f   : > { %v2060_v61 = vor.u32 %v2059_v19, %v2058_v12  ;;  %vm2061_vm12 = vcmp.lt.s32.totalorder %v2042_v21, 1  ;;  %vm2064_vm13 = vcmp.lt.s32.totalorder %v2042_v21, 4  ;;  %v2077_v0 = vshll.u32 %v2037_v53, 8 }
 0x250   : > { %v1992_v31 = vsub.s32 0, %v4460_v4  ;;  %v2045_v28 = vshrl.u32 %v4677_v58, %v2044_v59  ;;  %v2066_v18 = vsel %vm2064_vm13, %v2054_v36, 2102212464  ;;  %v2069_v55 = vsel %vm2061_vm12, %v2048_v7, %v2051_v51 }
 0x251   : > { %v2070_v9 = vsel %vm2064_vm13, %v2057_v14, 920167782  ;;  %vm2062_vm14 = vcmp.lt.s32.totalorder %v2042_v21, 2  ;;  %vm2063_vm15 = vcmp.lt.s32.totalorder %v2042_v21, 3  ;;  %v4468_v17 = vmul.f32 %v3039_v26, %v551_v23 }
 0x252   : > { %v2482_v25 = vmin.u32 %v1992_v31, %v4460_v4  ;;  %v2065_v47 = vsel %vm2061_vm12, %v2045_v28, %v2048_v7  ;;  %v2071_v30 = vsel %vm2063_vm15, %v2054_v36, %v2070_v9  ;;  %v2073_v50 = vsel %vm2061_vm12, %v2051_v51, %v2054_v36 }
 0x253   : > { %v2074_v43 = vsel %vm2064_vm13, %v2060_v61, 1326507024  ;;  %v2067_v34 = vsel %vm2063_vm15, %v2051_v51, %v2066_v18  ;;  %v2072_v22 = vsel %vm2062_vm14, %v2069_v55, %v2071_v30  ;;  %vm1915_vm0 = vweird.f32 %v4164_v41  ;;  %v4726_v41 = vld [vmem:[#allocation22_spill] sm:$0xff] }
 0x254   : > { %v1994_v16 = vclz %v2482_v25  ;;  %v2075_v42 = vsel %vm2063_vm15, %v2057_v14, %v2074_v43  ;;  %v4472_v57 = vmul.u32.u64.low %v2077_v0, %v2072_v22  ;;  %v4473_v60 = vmul.u32.u64.high %v2077_v0, %v2072_v22, %v4472_v57 }
 0x255   : > { %v2076_v44 = vsel %vm2062_vm14, %v2073_v50, %v2075_v42  ;;  %vm1917_vm1 = vcmp.lt.s32.totalorder %v1916_v15, 2  ;;  %v2248_v59 = vmul.f32 %v584_v40, %v584_v40  ;;  %v2068_v33 = vsel %vm2062_vm14, %v2065_v47, %v2067_v34 }
 0x256   : > { %v2483_v35 = vadd.s32 4294967294, %v1994_v16  ;;  %v4477_v26 = vmul.u32.u64.low %v2077_v0, %v2076_v44  ;;  %v4478_v24 = vmul.u32.u64.high %v2077_v0, %v2076_v44, %v4477_v26  ;;  %v2135_v2 = vand.u32 2139095040, %v4468_v17 }
 0x257   : > { %vm1918_vm2 = vcmp.eq.s32.totalorder %v1916_v15, 0  ;;  %vm1921_vm3 = vcmp.eq.s32.totalorder %v1916_v15, 2  ;;  %v1982_v32 = vadd.s32 %v4400_v54, %v4393_v56  ;;  %v2087_v49 = vadd.s32 1, %v4473_v60 }
 0x258   : > { %v2700_v53 = vpop.eup %2699  ;;  %vm2484_vm4 = vcmp.lt.s32.totalorder %v2483_v35, 0  ;;  %v2084_v12 = vmul.u32 %v2077_v0, %v2068_v33  ;;  %vm2086_vm5 = vc.u32 %v4478_v24, %v4472_v57  ;;  %v2136_v36 = vshrl.u32 %v2135_v2, 23 }
 0x259   : > { %v2702_v37 = vpop.eup %2701  ;;  %v1922_v38 = vxor.u32 2147483648, %v2700_v53  ;;  %v1997_v45 = vsel %vm2484_vm4, 0, %v2483_v35  ;;  %v2088_v54 = vsel %vm2086_vm5, %v2087_v49, %v4473_v60  ;;  %v474_v31 = vmul.f32 %v2944_v27, %v4306_v3 }
 0x25a   : > { %v1919_v39 = vxor.u32 2147483648, %v2702_v37  ;;  %v1998_v7 = vsub.s32 32, %v1997_v45  ;;  %v2002_v51 = vsub.s32 4294967266, %v1997_v45  ;;  %v1999_v19 = vshll.u32 %v4460_v4, %v1997_v45 }
 0x25b   : > { %v1923_v6 = vsel %vm1921_vm3, %v1922_v38, %v2702_v37  ;;  %v2704_v14 = vpop.eup %2703  ;;  %v2089_v0 = vadd.s32 %v2088_v54, %v2084_v12  ;;  %v2489_v4 = vadd.s32 4294967169, %v2136_v36  ;;  %v2264_v9 = vsub.f32 0.0, %v2248_v59 }
 0x25c   : > { %v1920_v21 = vsel %vm1918_vm2, %v2700_v53, %v1919_v39  ;;  %v2000_v40 = vshrl.u32 %v1982_v32, %v1998_v7  ;;  %v2003_v56 = vadd.s32 127, %v2002_v51  ;;  %v2012_v15 = vsub.s32 4, %v4447_v48 }
 0x25d   : > { %v1924_v23 = vsel %vm1917_vm1, %v1920_v21, %v1923_v6  ;;  %v2090_v25 = vadd.s32 536870912, %v2089_v0  ;;  %v2132_v47 = vand.u32 2147483647, %v4468_v17  ;;  %v2142_v30 = vadd.s32 1, %v2489_v4 }
 0x25e   : > { %v1925_v61 = vsel %vm1915_vm0, nan, %v1924_v23  ;;  %v2001_v18 = vor.u32 %v2000_v40, %v1999_v19  ;;  %v2004_v55 = vshll.u32 %v2003_v56, 23  ;;  %vm1928_vm6 = vcmp.lt.s32.totalorder %v4283_v52, 0 }
 0x25f   : > { %v2311_v28 = vmul.f32 %v2704_v14, %v1925_v61  ;;  %v506_v43 = vadd.f32 %v474_v31, %v4726_v41  ;;  %v4499_v16 = vshrl.u32 %v2090_v25, 30  ;;  %vm2143_vm7 = vcmp.gt.s32.totalorder %v2142_v30, 0 }
 0x260   : > { %v2005_v50 = vor.u32 4788187, %v2004_v55  ;;  %v2008_v34 = vcvt.s32.f32 %v2001_v18  ;;  %v2293_v22 = vmul.f32 1.442695, %v2264_v9  ;;  %v2144_v42 = vsel %vm2143_vm7, %v2142_v30, 0 }
 0x261   : > { %2327 = vst [vmem:[%s3365_s29 + $0x60] sm:$0xff] %v2311_v28  ;;  %v4504_v44 = vsel %vm1928_vm6, %v2012_v15, %v4447_v48  ;;  %v2092_v60 = vshll.u32 %v4499_v16, 30  ;;  %v2139_v35 = vand.u32 8388607, %v2132_v47  ;;  %v2146_v26 = vand.u32 31, %v2144_v42 }
 0x262   : > { %v2006_v3 = vand.u32 2147483647, %v2005_v50  ;;  %vm4511_vm8 = vcmp.le.f32.partialorder %v1926_v62, 0.7853982  ;;  %2705 = vpow2.f32 %v2293_v22  ;;  %v550_v38 = vadd.f32 %v3065_v10, %v506_v43 }
 0x263   : > { %v2093_v33 = vsub.s32 %v2089_v0, %v2092_v60  ;;  %v2147_v2 = vsub.s32 32, %v2146_v26  ;;  %v2015_v48 = vsel %vm4511_vm8, 0, %v4504_v44  ;;  %v2140_v32 = vor.u32 8388608, %v2139_v35 }
 0x264   : > { %v2009_v53 = vmul.f32 %v2008_v34, %v2006_v3  ;;  %v2149_v45 = vshll.u32 %v4677_v58, %v2146_v26  ;;  %v2152_v6 = vshll.u32 %v4678_v11, %v2146_v26  ;;  %v2145_v19 = vshrl.u32 %v2144_v42, 5 }
 0x265   : > { %v2095_v39 = vsub.s32 0, %v2093_v33  ;;  %v2150_v49 = vshrl.u32 %v4678_v11, %v2147_v2  ;;  %v2153_v7 = vshrl.u32 %v4679_v13, %v2147_v2  ;;  %v2156_v51 = vshrl.u32 %v4680_v8, %v2147_v2 }
 0x266   : > { %v2010_v37 = vxor.u32 2147483648, %v2009_v53  ;;  %v2155_v36 = vshll.u32 %v4679_v13, %v2146_v26  ;;  %v2158_v40 = vshll.u32 %v4680_v8, %v2146_v26  ;;  %v2159_v54 = vshrl.u32 %v4681_v1, %v2147_v2 }
 0x267   : > { %v2486_v21 = vmin.u32 %v2095_v39, %v2093_v33  ;;  %v2151_v14 = vor.u32 %v2150_v49, %v2149_v45  ;;  %v2154_v23 = vor.u32 %v2153_v7, %v2152_v6  ;;  %v2085_v61 = vadd.s32 %v4472_v57, %v4478_v24 }
 0x268   : > { %v2011_v62 = vsel %vm1928_vm6, %v2010_v37, %v2009_v53  ;;  %v2157_v11 = vor.u32 %v2156_v51, %v2155_v36  ;;  %v2161_v31 = vshll.u32 %v4681_v1, %v2146_v26  ;;  %v2162_v0 = vshrl.u32 %v4682_v5, %v2147_v2 }
 0x269   : > { %v2014_v12 = vsel %vm4511_vm8, %v4283_v52, %v2011_v62  ;;  %v2097_v56 = vclz %v2486_v21  ;;  %v2180_v4 = vshll.u32 %v2140_v32, 8  ;;  %v2148_v13 = vshrl.u32 %v4677_v58, %v2147_v2 }
 0x26a   : > { %2707 = vcosq.f32 %v2014_v12  ;;  %v2160_v18 = vor.u32 %v2159_v54, %v2158_v40  ;;  %vm2164_vm9 = vcmp.lt.s32.totalorder %v2145_v19, 1  ;;  %v2163_v55 = vor.u32 %v2162_v0, %v2161_v31 }
 0x26b   : > { %2709 = vsinq.f32 %v2014_v12  ;;  %v2487_v28 = vadd.s32 4294967294, %v2097_v56  ;;  %vm2165_vm10 = vcmp.lt.s32.totalorder %v2145_v19, 2  ;;  %vm2167_vm11 = vcmp.lt.s32.totalorder %v2145_v19, 4 }
 0x26c   : > { %v2172_v8 = vsel %vm2164_vm9, %v2151_v14, %v2154_v23  ;;  %vm2166_vm13 = vcmp.lt.s32.totalorder %v2145_v19, 3  ;;  %v2169_v9 = vsel %vm2167_vm11, %v2157_v11, 2102212464  ;;  %v2173_v15 = vsel %vm2167_vm11, %v2160_v18, 920167782 }
 0x26d   : > { %vm2488_vm12 = vcmp.lt.s32.totalorder %v2487_v28, 0  ;;  %v2174_v57 = vsel %vm2166_vm13, %v2157_v11, %v2173_v15  ;;  %v2176_v24 = vsel %vm2164_vm9, %v2154_v23, %v2157_v11  ;;  %v2177_v1 = vsel %vm2167_vm11, %v2163_v55, 1326507024 }
 0x26e   : > { %v2100_v25 = vsel %vm2488_vm12, 0, %v2487_v28  ;;  %v2168_v50 = vsel %vm2164_vm9, %v2148_v13, %v2151_v14  ;;  %v2175_v41 = vsel %vm2165_vm10, %v2172_v8, %v2174_v57  ;;  %v2170_v58 = vsel %vm2166_vm13, %v2154_v23, %v2169_v9 }
 0x26f   : > { %v2101_v30 = vsub.s32 32, %v2100_v25  ;;  %v2105_v5 = vsub.s32 4294967266, %v2100_v25  ;;  %v2178_v43 = vsel %vm2166_vm13, %v2160_v18, %v2177_v1  ;;  %v2706_v22 = vpop.eup %2705  ;;  %v2102_v42 = vshll.u32 %v2093_v33, %v2100_v25 }
 0x270   : > { %v4538_v3 = vmul.u32.u64.low %v2180_v4, %v2175_v41  ;;  %v4539_v34 = vmul.u32.u64.high %v2180_v4, %v2175_v41, %v4538_v3  ;;  %v2179_v35 = vsel %vm2165_vm10, %v2176_v24, %v2178_v43  ;;  %v2019_v26 = vand.u32 3, %v2015_v48 }
 0x271   : > { %v2103_v44 = vshrl.u32 %v2085_v61, %v2101_v30  ;;  %v2106_v60 = vadd.s32 127, %v2105_v5  ;;  %v4543_v53 = vmul.u32.u64.low %v2180_v4, %v2179_v35  ;;  %v4544_v59 = vmul.u32.u64.high %v2180_v4, %v2179_v35, %v4543_v53  ;;  %v4731_v5 = vld [vmem:[#allocation20_spill] sm:$0xff] }
 0x272   : > { %v2171_v39 = vsel %vm2165_vm10, %v2168_v50, %v2170_v58  ;;  %v2190_v32 = vadd.s32 1, %v4539_v34  ;;  %v585_v49 = vmul.f32 %v3072_v29, %v550_v38  ;;  %vm2024_vm14 = vcmp.eq.s32.totalorder %v2019_v26, 2 }
 0x273   : > { %v2104_v2 = vor.u32 %v2103_v44, %v2102_v42  ;;  %v2107_v37 = vshll.u32 %v2106_v60, 23  ;;  %v2187_v7 = vmul.u32 %v2180_v4, %v2171_v39  ;;  %vm2189_vm15 = vc.u32 %v4544_v59, %v4538_v3 }
 0x274   : > { %v2191_v21 = vsel %vm2189_vm15, %v2190_v32, %v4539_v34  ;;  %vm2021_vm0 = vcmp.eq.s32.totalorder %v2019_v26, 0  ;;  %vm2020_vm1 = vcmp.lt.s32.totalorder %v2019_v26, 2  ;;  %v2249_v23 = vmul.f32 %v585_v49, %v585_v49 }
 0x275   : > { %v2108_v62 = vor.u32 4788187, %v2107_v37  ;;  %v2111_v12 = vcvt.s32.f32 %v2104_v2  ;;  %v2192_v36 = vadd.s32 %v2191_v21, %v2187_v7  ;;  %vm2018_vm2 = vweird.f32 %v4283_v52 }
 0x276   : > { %vm2031_vm3 = vcmp.lt.s32.totalorder %v4362_v46, 0  ;;  %vm4558_vm4 = vcmp.le.f32.partialorder %v2029_v63, 0.7853982  ;;  %v2265_v28 = vsub.f32 0.0, %v2249_v23  ;;  %v2115_v18 = vsub.s32 4, %v4499_v16 }
 0x277   : > { %v2708_v45 = vpop.eup %2707  ;;  %v2109_v51 = vand.u32 2147483647, %v2108_v62  ;;  %v2193_v56 = vadd.s32 536870912, %v2192_v36  ;;  %v476_v25 = vmul.f32 %v2944_v27, %v4411_v20  ;;  %v2188_v43 = vadd.s32 %v4538_v3, %v4544_v59 }
 0x278   : > { %v2710_v6 = vpop.eup %2709  ;;  %v2025_v33 = vxor.u32 2147483648, %v2708_v45  ;;  %v2295_v8 = vmul.f32 1.442695, %v2265_v28  ;;  %v2116_v63 = vsel %vm2031_vm3, %v2115_v18, %v4499_v16  ;;  %vm2121_vm9 = vweird.f32 %v4362_v46 }
 0x279   : > { %v2022_v48 = vxor.u32 2147483648, %v2710_v6  ;;  %v2112_v38 = vmul.f32 %v2111_v12, %v2109_v51  ;;  %v4554_v31 = vshrl.u32 %v2193_v56, 30  ;;  %v2118_v57 = vsel %vm4558_vm4, 0, %v2116_v63 }
 0x27a   : > { %v2026_v19 = vsel %vm2024_vm14, %v2025_v33, %v2710_v6  ;;  %v2122_v30 = vand.u32 3, %v2118_v57  ;;  %v508_v50 = vadd.f32 %v476_v25, %v4731_v5  ;;  %vm2134_vm10 = vcmp.lt.s32.totalorder %v4468_v17, 0 }
 0x27b   : > { %v2023_v14 = vsel %vm2021_vm0, %v2708_v45, %v2022_v48  ;;  %v2113_v54 = vxor.u32 2147483648, %v2112_v38  ;;  %v2195_v13 = vshll.u32 %v4554_v31, 30  ;;  %vm2133_vm11 = vcmp.le.f32.partialorder %v2132_v47, 0.7853982 }
 0x27c   : > { %v2027_v40 = vsel %vm2020_vm1, %v2023_v14, %v2026_v19  ;;  %vm2127_vm6 = vcmp.eq.s32.totalorder %v2122_v30, 2  ;;  %v552_v27 = vadd.f32 %v3065_v10, %v508_v50  ;;  %vm2124_vm7 = vcmp.eq.s32.totalorder %v2122_v30, 0 }
 0x27d   : > { %v2028_v11 = vsel %vm2018_vm2, nan, %v2027_v40  ;;  %v2114_v4 = vsel %vm2031_vm3, %v2113_v54, %v2112_v38  ;;  %v2196_v55 = vsub.s32 %v2192_v36, %v2195_v13  ;;  %vm2123_vm8 = vcmp.lt.s32.totalorder %v2122_v30, 2 }
 0x27e   : > { %v2312_v61 = vmul.f32 %v2706_v22, %v2028_v11  ;;  %v2117_v52 = vsel %vm4558_vm4, %v4362_v46, %v2114_v4  ;;  %v586_v32 = vmul.f32 %v3072_v29, %v552_v27  ;;  %v2218_v29 = vsub.s32 4, %v4554_v31 }
 0x27f   : > { %2711 = vcosq.f32 %v2117_v52  ;;  %v2198_v9 = vsub.s32 0, %v2196_v55  ;;  %vm2224_vm15 = vweird.f32 %v4468_v17 }
 0x280   : > { %2328 = vst [vmem:[%s3365_s29 + $0x68] sm:$0xff] %v2312_v61  ;;  %2713 = vsinq.f32 %v2117_v52  ;;  %v2250_v33 = vmul.f32 %v586_v32, %v586_v32  ;;  %v2219_v21 = vsel %vm2134_vm10, %v2218_v29, %v4554_v31 }
 0x281   : > { %v2490_v15 = vmin.u32 %v2198_v9, %v2196_v55  ;;  %2715 = vpow2.f32 %v2295_v8  ;;  %v2221_v19 = vsel %vm2133_vm11, 0, %v2219_v21 }
 0x282   : > { %v2266_v46 = vsub.f32 0.0, %v2250_v33  ;;  %v2225_v36 = vand.u32 3, %v2221_v19 }
 0x283   : > { %v2200_v24 = vclz %v2490_v15 }
 0x284   : > { %v2297_v12 = vmul.f32 1.442695, %v2266_v46  ;;  %vm2230_vm12 = vcmp.eq.s32.totalorder %v2225_v36, 2  ;;  %vm2227_vm13 = vcmp.eq.s32.totalorder %v2225_v36, 0  ;;  %vm2226_vm14 = vcmp.lt.s32.totalorder %v2225_v36, 2 }
 0x285   : > { %v2491_v1 = vadd.s32 4294967294, %v2200_v24 }
 0x287   : > { %vm2492_vm5 = vcmp.lt.s32.totalorder %v2491_v1, 0 }
 0x288   : > { %v2203_v41 = vsel %vm2492_vm5, 0, %v2491_v1 }
 0x289   : > { %v2204_v16 = vsub.s32 32, %v2203_v41  ;;  %v2208_v34 = vsub.s32 4294967266, %v2203_v41  ;;  %v2205_v44 = vshll.u32 %v2196_v55, %v2203_v41 }
 0x28b   : > { %v2206_v60 = vshrl.u32 %v2188_v43, %v2204_v16  ;;  %v2209_v35 = vadd.s32 127, %v2208_v34 }
 0x28c   : > { %v2712_v58 = vpop.eup %2711 }
 0x28d   : > { %v2714_v22 = vpop.eup %2713  ;;  %v2128_v42 = vxor.u32 2147483648, %v2712_v58  ;;  %v2207_v2 = vor.u32 %v2206_v60, %v2205_v44  ;;  %v2210_v37 = vshll.u32 %v2209_v35, 23 }
 0x28e   : > { %v2125_v20 = vxor.u32 2147483648, %v2714_v22  ;;  %v2716_v59 = vpop.eup %2715 }
 0x28f   : > { %v2129_v26 = vsel %vm2127_vm6, %v2128_v42, %v2714_v22  ;;  %v2211_v45 = vor.u32 4788187, %v2210_v37  ;;  %v2214_v62 = vcvt.s32.f32 %v2207_v2 }
 0x290   : > { %v2126_v53 = vsel %vm2124_vm7, %v2712_v58, %v2125_v20 }
 0x291   : > { %v2130_v3 = vsel %vm2123_vm8, %v2126_v53, %v2129_v26  ;;  %v2212_v49 = vand.u32 2147483647, %v2211_v45 }
 0x292   : > { %v2131_v39 = vsel %vm2121_vm9, nan, %v2130_v3 }
 0x293   : > { %v2313_v10 = vmul.f32 %v2716_v59, %v2131_v39  ;;  %v2215_v6 = vmul.f32 %v2214_v62, %v2212_v49 }
 0x295   : > { %2329 = vst [vmem:[%s3365_s29 + $0x70] sm:$0xff] %v2313_v10  ;;  %v2216_v7 = vxor.u32 2147483648, %v2215_v6 }
 0x297   : > { %v2217_v48 = vsel %vm2134_vm10, %v2216_v7, %v2215_v6 }
 0x298   : > { %v2220_v51 = vsel %vm2133_vm11, %v4468_v17, %v2217_v48 }
 0x299   : > { %2717 = vcosq.f32 %v2220_v51 }
 0x29a   : > { %2719 = vsinq.f32 %v2220_v51 }
 0x29b   : > { %2721 = vpow2.f32 %v2297_v12 }
 0x2a6   : > { %v2718_v14 = vpop.eup %2717 }
 0x2a7   : > { %v2720_v38 = vpop.eup %2719  ;;  %v2231_v23 = vxor.u32 2147483648, %v2718_v14 }
 0x2a8   : > { %v2228_v47 = vxor.u32 2147483648, %v2720_v38  ;;  %v2722_v54 = vpop.eup %2721 }
 0x2a9   : > { %v2232_v40 = vsel %vm2230_vm12, %v2231_v23, %v2720_v38 }
 0x2aa   : > { %v2229_v56 = vsel %vm2227_vm13, %v2718_v14, %v2228_v47 }
 0x2ab   : > { %v2233_v11 = vsel %vm2226_vm14, %v2229_v56, %v2232_v40 }
 0x2ac   : > { %v2234_v61 = vsel %vm2224_vm15, nan, %v2233_v11 }
 0x2ad   : > { %v2314_v31 = vmul.f32 %v2722_v54, %v2234_v61 }
 0x2af   : > { %2330 = vst [vmem:[%s3365_s29 + $0x78] sm:$0xff] %v2314_v31 }
 0x2b0   : > { %2751 = shalt.err (!%p2748_p2)
}
 0x2b1   : > { %s2752_s13 = scalar_lea.hbm %s4592_s8, 2048  ;;  %s2756_s22 = scalar_lea.hbm %s4643_s4, 6144 }
 0x2b2   : > { %p2753_p3 = scmp.ne.s32.totalorder %s4592_s8, %s2752_s13  ;;  %p2757_p8 = scmp.lt.s32.totalorder %s4592_s8, %s4643_s4 }
 0x2b3   : > { %p2758_p11 = scmp.lt.s32.totalorder %s2756_s22, %s2752_s13 }
 0x2b4   : > { %p2754_p4 = pnand %p2753_p3, %p2879_p5 }
 0x2b5   : > { %p2759_p9 = por %p2758_p11, %p2757_p8 }
 0x2b6   : > { %p2755_p7 = pneg %p2754_p4 }
 0x2b8   : > { %p2760_p10 = pnand %p2759_p9, %p2755_p7 }
 0x2ba   : > { %2763 = shalt.err (!%p2760_p10)
}
 0x2bb   : > { %s2814_s28 = smov 128   ;;  %s2815_s29 = smov 8  }
 0x2bc   : > { %2567 = dma.vmem_to_hbm [thread:$0]  (%p2879_p5), %s4594_s5, 2048, %s4592_s8, %s4599_s19, %s2814_s28, %s2814_s28, %s2815_s29  }
 0x2bd PF: > { %p2579_p12 = scmp.ge.s32.totalorder %s2802_s18, 2  ;;  %s2360_s30 = sand.u32 1, %s2790_s15  }
 0x2be   : > { %s2361_s6 = scalar_lea.sflag [#allocation3], %s2360_s30 }
 0x2bf   : > { %p2574_p13 = pnand %p2579_p12, %p2883_p6 }
 0x2c1   : > { %p2575_p0 = pneg %p2574_p13 }
 0x2c3   : > { %2785 = dma.done.wait (%p2575_p0), %s2361_s6, 2048  }
 0x2c4   : > { %2787 = vsyncadd (%p2575_p0), %s2361_s6, 4294965248  ;;  %p15_p1 = scmp.ge.s32.totalorder %s2866_s21, 5   ;;  %s4732_s15 = smov %s2794_s16 }
 0x2c5   : > { %s4733_s16 = smov %s2798_s17  ;;  %s4734_s17 = smov %s2877_s24 }
 0x2c6   : > { %s4735_s18 = smov %s2866_s21  ;;  %17 = sbr.rel (!%p15_p1) target bundleno = 4 (0x4), region = 76 }
 0x2cb   :  { %2366 = vsyncpa [#allocation3], 1 }
 0x2cc   :  { %2368 = vsyncpa [#allocation3 + $0x1], 1 }
 0x2cd   :  { %2369 = vsyncpa [#allocation4], 1 }
 0x2ce   :  { %2371 = vsyncpa [#allocation4 + $0x1], 1 }

</bundles_post_ra>
